<compile_context>
chip_gen: v5e
topology: v5e:2x2
jax: 0.10.0
libtpu: 0.0.40
codegen_flags: <defaults>
</compile_context>

<pallas_src>
import functools

import jax
import jax.numpy as jnp
import numpy as np
from jax import lax
from jax.experimental import pallas as pl
from jax.experimental.pallas import tpu as pltpu


# ----------------------------------------------------------------------------
# Small helpers
# ----------------------------------------------------------------------------
def _ru(a, b):
    return -(-a // b) * b


def _same_pad(in_size, k, s):
    """TF-style 'same' padding amounts and output size."""
    out = -(-in_size // s)
    pad_total = max((out - 1) * s + k - in_size, 0)
    beg = pad_total // 2
    return beg, pad_total - beg, out


def _est_vmem_a(F, C, KKC, D_IN, FLAT_IN, HW_T, QB):
    in_blk = 2 * D_IN * _ru(C, 16) * _ru(FLAT_IN, 128) * 2      # double-buffered bf16
    w_blk = 2 * _ru(F, 16) * _ru(KKC, 128) * 2
    msk_blk = 2 * 16 * HW_T * 4
    y_blk = 2 * _ru(F, 8) * QB * 4                              # double-buffered f32 out
    st_blk = 4 * 8 * 128 * 4
    scratch = _ru(KKC, 16) * HW_T * 2                           # staged im2col operand
    live = 2 * _ru(F, 8) * HW_T * 4                             # per-depth matmul result
    return in_blk + w_blk + msk_blk + y_blk + st_blk + scratch + live


def _est_vmem_b(F, QB):
    return 4 * _ru(F, 8) * QB * 4 + 4 * _ru(F, 8) * 128 * 4


def _choose_d_tile(Do, F, C, KKC, kd, sd, HW_T, FLAT_IN, budget):
    # Prefer >= 2 slabs per sample (pipelining) when the depth allows it.
    cap = Do if Do < 4 else max(1, -(-Do // 2))
    for dt in range(cap, 0, -1):
        d_in = (dt - 1) * sd + kd
        qb = dt * HW_T
        if (_est_vmem_a(F, C, KKC, d_in, FLAT_IN, HW_T, qb) <= budget
                and _est_vmem_b(F, qb) <= budget):
            return dt
    return 1


def _vmem_limit(est_bytes):
    return int(min(100 << 20, max(est_bytes * 3 // 2 + (4 << 20), 16 << 20)))


# ----------------------------------------------------------------------------
# Kernel A: per (sample, depth-slab) conv3d (big-K matmul over in-VMEM im2col)
#            + per-slab two-pass GroupNorm partial statistics.
# ----------------------------------------------------------------------------
def _conv_stats_kernel(x_ref, w_ref, mask_ref, *rest, kd, kh, kw, sd, C, Wp,
                       HW_T, D_TILE, Do, Ho, Wo, use_bias):
    # x_ref    : (D_IN, C, FLAT_IN) bf16 -- halo'd depth slab, flat (H*W)-major rows
    # w_ref    : (F, kd*kh*kw*C)    bf16 -- tap-major folded weights
    # mask_ref : (1, HW_T)          f32  -- static (h, w) output-validity mask
    # bias_ref : (F, 1)             f32  -- only present when use_bias
    # y_ref    : (F, D_TILE*HW_T)   f32  -- conv output slab (lane-dense)
    # sum_ref  : (1, 128) f32, m2_ref : (1, 128) f32 -- per-slab partial stats
    # s_ref    : (kd*kh*kw*C, HW_T) bf16 VMEM scratch -- staged im2col operand
    if use_bias:
        bias_ref, y_ref, sum_ref, m2_ref, s_ref = rest
    else:
        y_ref, sum_ref, m2_ref, s_ref = rest
        bias_ref = None

    F = y_ref.shape[0]
    slab = pl.program_id(1)
    d_valid = jnp.minimum(D_TILE, Do - slab * D_TILE)        # valid output depths here

    mask = mask_ref[...]                                     # (1, HW_T)
    w = w_ref[...]                                           # (F, KK*C)
    bias = bias_ref[...] if use_bias else None               # (F, 1)

    def conv_body(d, s_acc):
        # Stage the (KK*C, HW_T) operand for output depth `d`: one contiguous lane
        # slice per tap -- no in-kernel reshapes or strided vector reads.
        for dz in range(kd):
            row = dz + d * sd
            for dy in range(kh):
                for dx in range(kw):
                    tap = (dz * kh + dy) * kw + dx
                    off = dy * Wp + dx
                    s_ref[tap * C:(tap + 1) * C, :] = x_ref[row, :, off:off + HW_T]
        y_d = jnp.dot(w, s_ref[...], preferred_element_type=jnp.float32)  # (F, HW_T)
        if use_bias:
            y_d = y_d + bias
        col = pl.multiple_of(d * HW_T, 128)
        y_ref[:, pl.ds(col, HW_T)] = y_d
        keep = (d < d_valid).astype(jnp.float32)
        return s_acc + keep * jnp.sum(y_d * mask)

    s_sum = lax.fori_loop(0, D_TILE, conv_body, jnp.float32(0.0))

    # Two-pass per-slab stats: slab mean first, then centered sum of squares
    # (avoids the E[x^2] - mean^2 cancellation the review flagged).
    cnt = (d_valid * (F * Ho * Wo)).astype(jnp.float32)
    mean_s = s_sum / cnt

    def m2_body(d, acc):
        col = pl.multiple_of(d * HW_T, 128)
        diff = (y_ref[:, pl.ds(col, HW_T)] - mean_s) * mask
        keep = (d < d_valid).astype(jnp.float32)
        return acc + keep * jnp.sum(diff * diff)

    m2 = lax.fori_loop(0, D_TILE, m2_body, jnp.float32(0.0))

    sum_ref[...] = jnp.broadcast_to(s_sum, (1, 128)).astype(jnp.float32)
    m2_ref[...] = jnp.broadcast_to(m2, (1, 128)).astype(jnp.float32)


# ----------------------------------------------------------------------------
# Kernel B: folded GroupNorm scale/shift + LeakyReLU (lane-dense elementwise pass)
# ----------------------------------------------------------------------------
def _norm_act_kernel(y_ref, scale_ref, shift_ref, o_ref, *, alpha, use_activation):
    v = y_ref[...] * scale_ref[...] + shift_ref[...]
    if use_activation:
        v = jnp.where(v >= 0.0, v, alpha * v)
    o_ref[...] = v.astype(o_ref.dtype)


# ----------------------------------------------------------------------------
# Wrapper
# ----------------------------------------------------------------------------
def conv_block_forward(x, weight, gamma, beta, bias=None, *, strides=1,
                       pad_value=0.0, lrelu_alpha=0.2, use_activation=True,
                       eps=1e-5, d_tile=None, vmem_budget_bytes=32 * 1024 * 1024):
    """x: (N, C, D, H, W) f32 (PyTorch NCDHW). Returns (N, F, Do, Ho, Wo) f32."""
    N, C, D, H, W = x.shape
    F, Cw, kd, kh, kw = weight.shape
    assert Cw == C
    if isinstance(strides, (tuple, list)):
        sd, sh, sw = (int(s) for s in strides)
    else:
        sd = sh = sw = int(strides)

    pd0, pd1, Do = _same_pad(D, kd, sd)
    ph0, ph1, Ho = _same_pad(H, kh, sh)
    pw0, pw1, Wo = _same_pad(W, kw, sw)
    Dp, Hp, Wp = D + pd0 + pd1, H + ph0 + ph1, W + pw0 + pw1
    KKC = kd * kh * kw * C

    # Flat (H*W)-major window geometry (lane axis of the staged matmul operand).
    HW_OV = (Ho - 1) * sh * Wp + (Wo - 1) * sw + 1
    HW_T = _ru(HW_OV, 128)
    FLAT_IN = (kh - 1) * Wp + (kw - 1) + HW_T

    use_bias = bias is not None

    # ---- tile size / VMEM derivation -------------------------------------
    if d_tile is None:
        D_TILE = _choose_d_tile(Do, F, C, KKC, kd, sd, HW_T, FLAT_IN,
                                vmem_budget_bytes)
    else:
        D_TILE = max(1, min(int(d_tile), Do))
    n_slabs = -(-Do // D_TILE)
    D_IN = (D_TILE - 1) * sd + kd
    QB = D_TILE * HW_T
    vmem_a = _vmem_limit(_est_vmem_a(F, C, KKC, D_IN, FLAT_IN, HW_T, QB))
    vmem_b = _vmem_limit(_est_vmem_b(F, QB))

    # ---- input prep: TF-same pad, flat rows, halo'd depth slabs, bf16 ----
    x_pad = jnp.pad(x.astype(jnp.float32),
                    ((0, 0), (0, 0), (pd0, pd1), (ph0, ph1), (pw0, pw1)),
                    mode="constant", constant_values=pad_value)
    x_flat = x_pad.reshape(N, C, Dp, Hp * Wp)
    if FLAT_IN > Hp * Wp:        # extra tail only feeds masked / cropped outputs
        x_flat = jnp.pad(x_flat, ((0, 0), (0, 0), (0, 0), (0, FLAT_IN - Hp * Wp)))
    Dp_ext = max(Dp, (n_slabs - 1) * D_TILE * sd + D_IN)
    if Dp_ext > Dp:              # extra depth rows only feed masked / cropped outputs
        x_flat = jnp.pad(x_flat, ((0, 0), (0, 0), (0, Dp_ext - Dp), (0, 0)))
    x_flat = x_flat.astype(jnp.bfloat16)

    didx = (np.arange(n_slabs)[:, None] * (D_TILE * sd)
            + np.arange(D_IN)[None, :]).reshape(-1).astype(np.int32)
    x_slab = jnp.take(x_flat, jnp.asarray(didx), axis=2)
    x_slab = x_slab.reshape(N, C, n_slabs, D_IN, FLAT_IN)
    x_slab = x_slab.transpose(0, 2, 3, 1, 4).reshape(N * n_slabs, D_IN, C, FLAT_IN)

    # Tap-major folded weights: k = ((dz*kh+dy)*kw+dx)*C + c.
    w2 = jnp.transpose(weight, (0, 2, 3, 4, 1)).reshape(F, KKC).astype(jnp.bfloat16)

    # Static (h, w) output-validity mask over the over-computed flat columns.
    j = np.arange(HW_T)
    r, t = j // Wp, j % Wp
    valid = ((r % sh == 0) & (r // sh < Ho) & (t % sw == 0) & (t // sw < Wo))
    mask_row = jnp.asarray(valid.astype(np.float32)).reshape(1, HW_T)

    # ---- kernel A: conv + per-slab GroupNorm partials ---------------------
    kernel_a = functools.partial(
        _conv_stats_kernel, kd=kd, kh=kh, kw=kw, sd=sd, C=C, Wp=Wp, HW_T=HW_T,
        D_TILE=D_TILE, Do=Do, Ho=Ho, Wo=Wo, use_bias=use_bias)

    in_specs = [
        pl.BlockSpec((None, D_IN, C, FLAT_IN),
                     lambda n, s: (n * n_slabs + s, 0, 0, 0)),
        pl.BlockSpec((F, KKC), lambda n, s: (0, 0)),
        pl.BlockSpec((1, HW_T), lambda n, s: (0, 0)),
    ]
    inputs = [x_slab, w2, mask_row]
    if use_bias:
        in_specs.append(pl.BlockSpec((F, 1), lambda n, s: (0, 0)))
        inputs.append(jnp.asarray(bias, jnp.float32).reshape(F, 1))

    y_flat, ssum, sm2 = pl.pallas_call(
        kernel_a,
        grid=(N, n_slabs),
        in_specs=in_specs,
        out_specs=[
            pl.BlockSpec((None, F, QB), lambda n, s: (n, 0, s)),
            pl.BlockSpec((None, None, 1, 128), lambda n, s: (n, s, 0, 0)),
            pl.BlockSpec((None, None, 1, 128), lambda n, s: (n, s, 0, 0)),
        ],
        out_shape=[
            jax.ShapeDtypeStruct((N, F, n_slabs * QB), jnp.float32),
            jax.ShapeDtypeStruct((N, n_slabs, 1, 128), jnp.float32),
            jax.ShapeDtypeStruct((N, n_slabs, 1, 128), jnp.float32),
        ],
        scratch_shapes=[pltpu.VMEM((KKC, HW_T), jnp.bfloat16)],
        compiler_params=pltpu.CompilerParams(
            dimension_semantics=("parallel", "parallel"),
            vmem_limit_bytes=vmem_a),
    )(*inputs)

    # ---- exact pooled GroupNorm stats merge (tiny, in XLA) ----------------
    part_sum = ssum[:, :, 0, 0]                               # (N, n_slabs)
    part_m2 = sm2[:, :, 0, 0]
    d_valid = np.minimum(D_TILE, Do - np.arange(n_slabs) * D_TILE)
    cnt = jnp.asarray(d_valid * (F * Ho * Wo), jnp.float32)   # (n_slabs,)
    total = float(F * Do * Ho * Wo)
    mean_slab = part_sum / cnt[None, :]
    gmean = jnp.sum(part_sum, axis=1) / total                 # (N,)
    m2_tot = jnp.sum(part_m2 + cnt[None, :] * (mean_slab - gmean[:, None]) ** 2,
                     axis=1)
    rstd = lax.rsqrt(m2_tot / total + eps)                    # (N,)

    gamma_f = jnp.asarray(gamma, jnp.float32)
    beta_f = jnp.asarray(beta, jnp.float32)
    scale = (gamma_f[None, :] * rstd[:, None]).reshape(N, F, 1)
    shift = (beta_f[None, :]
             - gmean[:, None] * gamma_f[None, :] * rstd[:, None]).reshape(N, F, 1)

    # ---- kernel B: folded scale/shift + LeakyReLU --------------------------
    kernel_b = functools.partial(_norm_act_kernel, alpha=float(lrelu_alpha),
                                 use_activation=bool(use_activation))
    out_flat = pl.pallas_call(
        kernel_b,
        grid=(N, n_slabs),
        in_specs=[
            pl.BlockSpec((None, F, QB), lambda n, s: (n, 0, s)),
            pl.BlockSpec((None, F, 1), lambda n, s: (n, 0, 0)),
            pl.BlockSpec((None, F, 1), lambda n, s: (n, 0, 0)),
        ],
        out_specs=pl.BlockSpec((None, F, QB), lambda n, s: (n, 0, s)),
        out_shape=jax.ShapeDtypeStruct((N, F, n_slabs * QB), jnp.float32),
        compiler_params=pltpu.CompilerParams(
            dimension_semantics=("parallel", "parallel"),
            vmem_limit_bytes=vmem_b),
    )(y_flat, scale, shift)

    # ---- crop the over-computed flat columns back to NCDHW ----------------
    y5 = out_flat.reshape(N, F, n_slabs, D_TILE, HW_T)
    rows = (Ho - 1) * sh + 1
    need = rows * Wp
    if need <= HW_T:
        y5 = y5[..., :need]
    else:
        y5 = jnp.pad(y5, ((0, 0), (0, 0), (0, 0), (0, 0), (0, need - HW_T)))
    y6 = y5.reshape(N, F, n_slabs, D_TILE, rows, Wp)
    y6 = y6[:, :, :, :, ::sh, :(Wo - 1) * sw + 1:sw]
    out = y6.reshape(N, F, n_slabs * D_TILE, Ho, Wo)[:, :, :Do]
    return out


# ----------------------------------------------------------------------------
# Pure-JAX reference (sanity check against the fused kernels)
# ----------------------------------------------------------------------------
def _reference(x, weight, gamma, beta, bias=None, *, strides, pad_value,
               lrelu_alpha, use_activation, eps=1e-5):
    N, C, D, H, W = x.shape
    F = weight.shape[0]
    kd, kh, kw = weight.shape[2:]
    if isinstance(strides, (tuple, list)):
        sd, sh, sw = (int(s) for s in strides)
    else:
        sd = sh = sw = int(strides)
    (pd0, pd1, _), (ph0, ph1, _), (pw0, pw1, _) = (
        _same_pad(D, kd, sd), _same_pad(H, kh, sh), _same_pad(W, kw, sw))
    x_p = jnp.pad(x, ((0, 0), (0, 0), (pd0, pd1), (ph0, ph1), (pw0, pw1)),
                  constant_values=pad_value)
    y = lax.conv_general_dilated(
        x_p, weight, window_strides=(sd, sh, sw), padding="VALID",
        dimension_numbers=("NCDHW", "OIDHW", "NCDHW"))
    if bias is not None:
        y = y + bias.reshape(1, F, 1, 1, 1)
    mean = jnp.mean(y, axis=(1, 2, 3, 4), keepdims=True)
    var = jnp.mean((y - mean) ** 2, axis=(1, 2, 3, 4), keepdims=True)
    y = (y - mean) * lax.rsqrt(var + eps)
    y = y * gamma.reshape(1, F, 1, 1, 1) + beta.reshape(1, F, 1, 1, 1)
    if use_activation:
        y = jnp.where(y >= 0, y, lrelu_alpha * y)
    return y


if __name__ == "__main__":
    def _run_case(seed, N, C, D, H, W, F, ksize, strides, pad_value, alpha,
                  use_activation, use_bias, d_tile, tol):
        key = jax.random.PRNGKey(seed)
        kx, kw_, kg, kb, kbias = jax.random.split(key, 5)
        x = jax.random.normal(kx, (N, C, D, H, W), dtype=jnp.float32)
        if isinstance(ksize, int):
            kd = kh = kw = ksize
        else:
            kd, kh, kw = ksize
        weight = 0.1 * jax.random.normal(kw_, (F, C, kd, kh, kw), dtype=jnp.float32)
        gamma = 1.0 + 0.1 * jax.random.normal(kg, (F,), dtype=jnp.float32)
        beta = 0.1 * jax.random.normal(kb, (F,), dtype=jnp.float32)
        bias = (0.1 * jax.random.normal(kbias, (F,), dtype=jnp.float32)
                if use_bias else None)

        out = conv_block_forward(
            x, weight, gamma, beta, bias, strides=strides, pad_value=pad_value,
            lrelu_alpha=alpha, use_activation=use_activation, d_tile=d_tile)
        out = jax.block_until_ready(out)

        ref = _reference(
            x, weight, gamma, beta, bias, strides=strides, pad_value=pad_value,
            lrelu_alpha=alpha, use_activation=use_activation)
        ref = jax.block_until_ready(ref)

        assert out.shape == ref.shape, (out.shape, ref.shape)
        max_err = float(jnp.max(jnp.abs(out - ref)))
        # bf16 matmul operands (f32 accumulation / f32 stats) -> loose tolerance.
        assert jnp.allclose(out, ref, atol=tol, rtol=tol), max_err

    # Case 1: stride 1, LeakyReLU, no bias, default (multi-slab) depth tiling.
    _run_case(seed=0, N=2, C=4, D=8, H=8, W=8, F=8, ksize=3, strides=1,
              pad_value=0.0, alpha=0.2, use_activation=True, use_bias=False,
              d_tile=None, tol=4e-2)
    # Case 2: odd shapes, stride 2, conv bias, no activation, forced small depth
    # slab (exercises the partial last slab + pooled GroupNorm stats merge).
    _run_case(seed=1, N=1, C=5, D=9, H=10, W=7, F=6, ksize=3, strides=2,
              pad_value=0.3, alpha=0.1, use_activation=False, use_bias=True,
              d_tile=2, tol=4e-2)

    print("KERNEL_OK")
</pallas_src>

<mosaic_0001>
module attributes {stable_mosaic.version = 11 : i64} {
  func.func @_conv_stats_kernel(%arg0: i32, %arg1: i32, %arg2: memref<1x6x4x150xbf16, #tpu.memory_space<vmem>>, %arg3: memref<8x108xbf16, #tpu.memory_space<vmem>>, %arg4: memref<1x128xf32, #tpu.memory_space<vmem>>, %arg5: memref<1x8x512xf32, #tpu.memory_space<vmem>>, %arg6: memref<1x1x1x128xf32, #tpu.memory_space<vmem>>, %arg7: memref<1x1x1x128xf32, #tpu.memory_space<vmem>>, %arg8: memref<108x128xbf16, #tpu.memory_space<vmem>>) attributes {dimension_semantics = [#tpu.dimension_semantics<parallel>, #tpu.dimension_semantics<parallel>], iteration_bounds = array<i64: 2, 2>, scalar_prefetch = 0 : i64, scratch_operands = 1 : i64, tpu.core_type = #tpu.core_type<tc>, window_params = [{transform_indices = @transform_0, window_bounds = array<i64: 1, 6, 4, 150>}, {pipeline_mode = #tpu.pipeline_mode<synchronous>, transform_indices = @transform_1, window_bounds = array<i64: 8, 108>}, {pipeline_mode = #tpu.pipeline_mode<synchronous>, transform_indices = @transform_2, window_bounds = array<i64: 1, 128>}, {transform_indices = @transform_3, window_bounds = array<i64: 1, 8, 512>}, {transform_indices = @transform_4, window_bounds = array<i64: 1, 1, 1, 128>}, {transform_indices = @transform_5, window_bounds = array<i64: 1, 1, 1, 128>}]} {
    %c4_i32 = arith.constant 4 : i32
    %0 = arith.muli %arg1, %c4_i32 : i32
    %c8_i32 = arith.constant 8 : i32
    %1 = arith.subi %c8_i32, %0 : i32
    %c4_i32_0 = arith.constant 4 : i32
    %2 = arith.minsi %c4_i32_0, %1 : i32
    %c0 = arith.constant 0 : index
    %c0_1 = arith.constant 0 : index
    %3 = vector.load %arg4[%c0, %c0_1] : memref<1x128xf32, #tpu.memory_space<vmem>>, vector<1x128xf32>
    %c0_2 = arith.constant 0 : index
    %c0_3 = arith.constant 0 : index
    %4 = vector.load %arg3[%c0_2, %c0_3] : memref<8x108xbf16, #tpu.memory_space<vmem>>, vector<8x108xbf16>
    %cst = arith.constant 0.000000e+00 : f32
    %c0_i32 = arith.constant 0 : i32
    %c4_i32_4 = arith.constant 4 : i32
    %5 = arith.addi %c0_i32, %c4_i32_4 : i32
    %c1_i32 = arith.constant 1 : i32
    %6 = scf.for %arg9 = %c0_i32 to %5 step %c1_i32 iter_args(%arg10 = %cst) -> (f32)  : i32 {
      %c1_i32_19 = arith.constant 1 : i32
      %20 = arith.muli %arg9, %c1_i32_19 : i32
      %c0_i32_20 = arith.constant 0 : i32
      %21 = arith.addi %c0_i32_20, %20 : i32
      %c0_21 = arith.constant 0 : index
      %22 = arith.index_cast %21 : i32 to index
      %c0_22 = arith.constant 0 : index
      %c0_23 = arith.constant 0 : index
      %23 = vector.load %arg2[%c0_21, %22, %c0_22, %c0_23] : memref<1x6x4x150xbf16, #tpu.memory_space<vmem>>, vector<1x1x4x128xbf16>
      %24 = vector.shape_cast %23 : vector<1x1x4x128xbf16> to vector<4x128xbf16>
      %c0_24 = arith.constant 0 : index
      %c0_25 = arith.constant 0 : index
      %25 = vector.load %arg8[%c0_24, %c0_25] : memref<108x128xbf16, #tpu.memory_space<vmem>>, vector<4x128xbf16>
      tpu.vector_store %arg8[%c0_24, %c0_25], %24 {strides = array<i32>} : memref<108x128xbf16, #tpu.memory_space<vmem>>, vector<4x128xbf16>,
      %c0_26 = arith.constant 0 : index
      %26 = arith.index_cast %21 : i32 to index
      %c0_27 = arith.constant 0 : index
      %c1 = arith.constant 1 : index
      %27 = vector.load %arg2[%c0_26, %26, %c0_27, %c1] : memref<1x6x4x150xbf16, #tpu.memory_space<vmem>>, vector<1x1x4x128xbf16>
      %28 = vector.shape_cast %27 : vector<1x1x4x128xbf16> to vector<4x128xbf16>
      %c4 = arith.constant 4 : index
      %c0_28 = arith.constant 0 : index
      %29 = vector.load %arg8[%c4, %c0_28] : memref<108x128xbf16, #tpu.memory_space<vmem>>, vector<4x128xbf16>
      tpu.vector_store %arg8[%c4, %c0_28], %28 {strides = array<i32>} : memref<108x128xbf16, #tpu.memory_space<vmem>>, vector<4x128xbf16>,
      %c0_29 = arith.constant 0 : index
      %30 = arith.index_cast %21 : i32 to index
      %c0_30 = arith.constant 0 : index
      %c2 = arith.constant 2 : index
      %31 = vector.load %arg2[%c0_29, %30, %c0_30, %c2] : memref<1x6x4x150xbf16, #tpu.memory_space<vmem>>, vector<1x1x4x128xbf16>
      %32 = vector.shape_cast %31 : vector<1x1x4x128xbf16> to vector<4x128xbf16>
      %c8 = arith.constant 8 : index
      %c0_31 = arith.constant 0 : index
      %33 = vector.load %arg8[%c8, %c0_31] : memref<108x128xbf16, #tpu.memory_space<vmem>>, vector<4x128xbf16>
      tpu.vector_store %arg8[%c8, %c0_31], %32 {strides = array<i32>} : memref<108x128xbf16, #tpu.memory_space<vmem>>, vector<4x128xbf16>,
      %c0_32 = arith.constant 0 : index
      %34 = arith.index_cast %21 : i32 to index
      %c0_33 = arith.constant 0 : index
      %c10 = arith.constant 10 : index
      %35 = vector.load %arg2[%c0_32, %34, %c0_33, %c10] : memref<1x6x4x150xbf16, #tpu.memory_space<vmem>>, vector<1x1x4x128xbf16>
      %36 = vector.shape_cast %35 : vector<1x1x4x128xbf16> to vector<4x128xbf16>
      %c12 = arith.constant 12 : index
      %c0_34 = arith.constant 0 : index
      %37 = vector.load %arg8[%c12, %c0_34] : memref<108x128xbf16, #tpu.memory_space<vmem>>, vector<4x128xbf16>
      tpu.vector_store %arg8[%c12, %c0_34], %36 {strides = array<i32>} : memref<108x128xbf16, #tpu.memory_space<vmem>>, vector<4x128xbf16>,
      %c0_35 = arith.constant 0 : index
      %38 = arith.index_cast %21 : i32 to index
      %c0_36 = arith.constant 0 : index
      %c11 = arith.constant 11 : index
      %39 = vector.load %arg2[%c0_35, %38, %c0_36, %c11] : memref<1x6x4x150xbf16, #tpu.memory_space<vmem>>, vector<1x1x4x128xbf16>
      %40 = vector.shape_cast %39 : vector<1x1x4x128xbf16> to vector<4x128xbf16>
      %c16 = arith.constant 16 : index
      %c0_37 = arith.constant 0 : index
      %41 = vector.load %arg8[%c16, %c0_37] : memref<108x128xbf16, #tpu.memory_space<vmem>>, vector<4x128xbf16>
      tpu.vector_store %arg8[%c16, %c0_37], %40 {strides = array<i32>} : memref<108x128xbf16, #tpu.memory_space<vmem>>, vector<4x128xbf16>,
      %c0_38 = arith.constant 0 : index
      %42 = arith.index_cast %21 : i32 to index
      %c0_39 = arith.constant 0 : index
      %c12_40 = arith.constant 12 : index
      %43 = vector.load %arg2[%c0_38, %42, %c0_39, %c12_40] : memref<1x6x4x150xbf16, #tpu.memory_space<vmem>>, vector<1x1x4x128xbf16>
      %44 = vector.shape_cast %43 : vector<1x1x4x128xbf16> to vector<4x128xbf16>
      %c20 = arith.constant 20 : index
      %c0_41 = arith.constant 0 : index
      %45 = vector.load %arg8[%c20, %c0_41] : memref<108x128xbf16, #tpu.memory_space<vmem>>, vector<4x128xbf16>
      tpu.vector_store %arg8[%c20, %c0_41], %44 {strides = array<i32>} : memref<108x128xbf16, #tpu.memory_space<vmem>>, vector<4x128xbf16>,
      %c0_42 = arith.constant 0 : index
      %46 = arith.index_cast %21 : i32 to index
      %c0_43 = arith.constant 0 : index
      %c20_44 = arith.constant 20 : index
      %47 = vector.load %arg2[%c0_42, %46, %c0_43, %c20_44] : memref<1x6x4x150xbf16, #tpu.memory_space<vmem>>, vector<1x1x4x128xbf16>
      %48 = vector.shape_cast %47 : vector<1x1x4x128xbf16> to vector<4x128xbf16>
      %c24 = arith.constant 24 : index
      %c0_45 = arith.constant 0 : index
      %49 = vector.load %arg8[%c24, %c0_45] : memref<108x128xbf16, #tpu.memory_space<vmem>>, vector<4x128xbf16>
      tpu.vector_store %arg8[%c24, %c0_45], %48 {strides = array<i32>} : memref<108x128xbf16, #tpu.memory_space<vmem>>, vector<4x128xbf16>,
      %c0_46 = arith.constant 0 : index
      %50 = arith.index_cast %21 : i32 to index
      %c0_47 = arith.constant 0 : index
      %c21 = arith.constant 21 : index
      %51 = vector.load %arg2[%c0_46, %50, %c0_47, %c21] : memref<1x6x4x150xbf16, #tpu.memory_space<vmem>>, vector<1x1x4x128xbf16>
      %52 = vector.shape_cast %51 : vector<1x1x4x128xbf16> to vector<4x128xbf16>
      %c28 = arith.constant 28 : index
      %c0_48 = arith.constant 0 : index
      %53 = vector.load %arg8[%c28, %c0_48] : memref<108x128xbf16, #tpu.memory_space<vmem>>, vector<4x128xbf16>
      tpu.vector_store %arg8[%c28, %c0_48], %52 {strides = array<i32>} : memref<108x128xbf16, #tpu.memory_space<vmem>>, vector<4x128xbf16>,
      %c0_49 = arith.constant 0 : index
      %54 = arith.index_cast %21 : i32 to index
      %c0_50 = arith.constant 0 : index
      %c22 = arith.constant 22 : index
      %55 = vector.load %arg2[%c0_49, %54, %c0_50, %c22] : memref<1x6x4x150xbf16, #tpu.memory_space<vmem>>, vector<1x1x4x128xbf16>
      %56 = vector.shape_cast %55 : vector<1x1x4x128xbf16> to vector<4x128xbf16>
      %c32 = arith.constant 32 : index
      %c0_51 = arith.constant 0 : index
      %57 = vector.load %arg8[%c32, %c0_51] : memref<108x128xbf16, #tpu.memory_space<vmem>>, vector<4x128xbf16>
      tpu.vector_store %arg8[%c32, %c0_51], %56 {strides = array<i32>} : memref<108x128xbf16, #tpu.memory_space<vmem>>, vector<4x128xbf16>,
      %c1_i32_52 = arith.constant 1 : i32
      %58 = arith.muli %arg9, %c1_i32_52 : i32
      %c1_i32_53 = arith.constant 1 : i32
      %59 = arith.addi %c1_i32_53, %58 : i32
      %c0_54 = arith.constant 0 : index
      %60 = arith.index_cast %59 : i32 to index
      %c0_55 = arith.constant 0 : index
      %c0_56 = arith.constant 0 : index
      %61 = vector.load %arg2[%c0_54, %60, %c0_55, %c0_56] : memref<1x6x4x150xbf16, #tpu.memory_space<vmem>>, vector<1x1x4x128xbf16>
      %62 = vector.shape_cast %61 : vector<1x1x4x128xbf16> to vector<4x128xbf16>
      %c36 = arith.constant 36 : index
      %c0_57 = arith.constant 0 : index
      %63 = vector.load %arg8[%c36, %c0_57] : memref<108x128xbf16, #tpu.memory_space<vmem>>, vector<4x128xbf16>
      tpu.vector_store %arg8[%c36, %c0_57], %62 {strides = array<i32>} : memref<108x128xbf16, #tpu.memory_space<vmem>>, vector<4x128xbf16>,
      %c0_58 = arith.constant 0 : index
      %64 = arith.index_cast %59 : i32 to index
      %c0_59 = arith.constant 0 : index
      %c1_60 = arith.constant 1 : index
      %65 = vector.load %arg2[%c0_58, %64, %c0_59, %c1_60] : memref<1x6x4x150xbf16, #tpu.memory_space<vmem>>, vector<1x1x4x128xbf16>
      %66 = vector.shape_cast %65 : vector<1x1x4x128xbf16> to vector<4x128xbf16>
      %c40 = arith.constant 40 : index
      %c0_61 = arith.constant 0 : index
      %67 = vector.load %arg8[%c40, %c0_61] : memref<108x128xbf16, #tpu.memory_space<vmem>>, vector<4x128xbf16>
      tpu.vector_store %arg8[%c40, %c0_61], %66 {strides = array<i32>} : memref<108x128xbf16, #tpu.memory_space<vmem>>, vector<4x128xbf16>,
      %c0_62 = arith.constant 0 : index
      %68 = arith.index_cast %59 : i32 to index
      %c0_63 = arith.constant 0 : index
      %c2_64 = arith.constant 2 : index
      %69 = vector.load %arg2[%c0_62, %68, %c0_63, %c2_64] : memref<1x6x4x150xbf16, #tpu.memory_space<vmem>>, vector<1x1x4x128xbf16>
      %70 = vector.shape_cast %69 : vector<1x1x4x128xbf16> to vector<4x128xbf16>
      %c44 = arith.constant 44 : index
      %c0_65 = arith.constant 0 : index
      %71 = vector.load %arg8[%c44, %c0_65] : memref<108x128xbf16, #tpu.memory_space<vmem>>, vector<4x128xbf16>
      tpu.vector_store %arg8[%c44, %c0_65], %70 {strides = array<i32>} : memref<108x128xbf16, #tpu.memory_space<vmem>>, vector<4x128xbf16>,
      %c0_66 = arith.constant 0 : index
      %72 = arith.index_cast %59 : i32 to index
      %c0_67 = arith.constant 0 : index
      %c10_68 = arith.constant 10 : index
      %73 = vector.load %arg2[%c0_66, %72, %c0_67, %c10_68] : memref<1x6x4x150xbf16, #tpu.memory_space<vmem>>, vector<1x1x4x128xbf16>
      %74 = vector.shape_cast %73 : vector<1x1x4x128xbf16> to vector<4x128xbf16>
      %c48 = arith.constant 48 : index
      %c0_69 = arith.constant 0 : index
      %75 = vector.load %arg8[%c48, %c0_69] : memref<108x128xbf16, #tpu.memory_space<vmem>>, vector<4x128xbf16>
      tpu.vector_store %arg8[%c48, %c0_69], %74 {strides = array<i32>} : memref<108x128xbf16, #tpu.memory_space<vmem>>, vector<4x128xbf16>,
      %c0_70 = arith.constant 0 : index
      %76 = arith.index_cast %59 : i32 to index
      %c0_71 = arith.constant 0 : index
      %c11_72 = arith.constant 11 : index
      %77 = vector.load %arg2[%c0_70, %76, %c0_71, %c11_72] : memref<1x6x4x150xbf16, #tpu.memory_space<vmem>>, vector<1x1x4x128xbf16>
      %78 = vector.shape_cast %77 : vector<1x1x4x128xbf16> to vector<4x128xbf16>
      %c52 = arith.constant 52 : index
      %c0_73 = arith.constant 0 : index
      %79 = vector.load %arg8[%c52, %c0_73] : memref<108x128xbf16, #tpu.memory_space<vmem>>, vector<4x128xbf16>
      tpu.vector_store %arg8[%c52, %c0_73], %78 {strides = array<i32>} : memref<108x128xbf16, #tpu.memory_space<vmem>>, vector<4x128xbf16>,
      %c0_74 = arith.constant 0 : index
      %80 = arith.index_cast %59 : i32 to index
      %c0_75 = arith.constant 0 : index
      %c12_76 = arith.constant 12 : index
      %81 = vector.load %arg2[%c0_74, %80, %c0_75, %c12_76] : memref<1x6x4x150xbf16, #tpu.memory_space<vmem>>, vector<1x1x4x128xbf16>
      %82 = vector.shape_cast %81 : vector<1x1x4x128xbf16> to vector<4x128xbf16>
      %c56 = arith.constant 56 : index
      %c0_77 = arith.constant 0 : index
      %83 = vector.load %arg8[%c56, %c0_77] : memref<108x128xbf16, #tpu.memory_space<vmem>>, vector<4x128xbf16>
      tpu.vector_store %arg8[%c56, %c0_77], %82 {strides = array<i32>} : memref<108x128xbf16, #tpu.memory_space<vmem>>, vector<4x128xbf16>,
      %c0_78 = arith.constant 0 : index
      %84 = arith.index_cast %59 : i32 to index
      %c0_79 = arith.constant 0 : index
      %c20_80 = arith.constant 20 : index
      %85 = vector.load %arg2[%c0_78, %84, %c0_79, %c20_80] : memref<1x6x4x150xbf16, #tpu.memory_space<vmem>>, vector<1x1x4x128xbf16>
      %86 = vector.shape_cast %85 : vector<1x1x4x128xbf16> to vector<4x128xbf16>
      %c60 = arith.constant 60 : index
      %c0_81 = arith.constant 0 : index
      %87 = vector.load %arg8[%c60, %c0_81] : memref<108x128xbf16, #tpu.memory_space<vmem>>, vector<4x128xbf16>
      tpu.vector_store %arg8[%c60, %c0_81], %86 {strides = array<i32>} : memref<108x128xbf16, #tpu.memory_space<vmem>>, vector<4x128xbf16>,
      %c0_82 = arith.constant 0 : index
      %88 = arith.index_cast %59 : i32 to index
      %c0_83 = arith.constant 0 : index
      %c21_84 = arith.constant 21 : index
      %89 = vector.load %arg2[%c0_82, %88, %c0_83, %c21_84] : memref<1x6x4x150xbf16, #tpu.memory_space<vmem>>, vector<1x1x4x128xbf16>
      %90 = vector.shape_cast %89 : vector<1x1x4x128xbf16> to vector<4x128xbf16>
      %c64 = arith.constant 64 : index
      %c0_85 = arith.constant 0 : index
      %91 = vector.load %arg8[%c64, %c0_85] : memref<108x128xbf16, #tpu.memory_space<vmem>>, vector<4x128xbf16>
      tpu.vector_store %arg8[%c64, %c0_85], %90 {strides = array<i32>} : memref<108x128xbf16, #tpu.memory_space<vmem>>, vector<4x128xbf16>,
      %c0_86 = arith.constant 0 : index
      %92 = arith.index_cast %59 : i32 to index
      %c0_87 = arith.constant 0 : index
      %c22_88 = arith.constant 22 : index
      %93 = vector.load %arg2[%c0_86, %92, %c0_87, %c22_88] : memref<1x6x4x150xbf16, #tpu.memory_space<vmem>>, vector<1x1x4x128xbf16>
      %94 = vector.shape_cast %93 : vector<1x1x4x128xbf16> to vector<4x128xbf16>
      %c68 = arith.constant 68 : index
      %c0_89 = arith.constant 0 : index
      %95 = vector.load %arg8[%c68, %c0_89] : memref<108x128xbf16, #tpu.memory_space<vmem>>, vector<4x128xbf16>
      tpu.vector_store %arg8[%c68, %c0_89], %94 {strides = array<i32>} : memref<108x128xbf16, #tpu.memory_space<vmem>>, vector<4x128xbf16>,
      %c1_i32_90 = arith.constant 1 : i32
      %96 = arith.muli %arg9, %c1_i32_90 : i32
      %c2_i32 = arith.constant 2 : i32
      %97 = arith.addi %c2_i32, %96 : i32
      %c0_91 = arith.constant 0 : index
      %98 = arith.index_cast %97 : i32 to index
      %c0_92 = arith.constant 0 : index
      %c0_93 = arith.constant 0 : index
      %99 = vector.load %arg2[%c0_91, %98, %c0_92, %c0_93] : memref<1x6x4x150xbf16, #tpu.memory_space<vmem>>, vector<1x1x4x128xbf16>
      %100 = vector.shape_cast %99 : vector<1x1x4x128xbf16> to vector<4x128xbf16>
      %c72 = arith.constant 72 : index
      %c0_94 = arith.constant 0 : index
      %101 = vector.load %arg8[%c72, %c0_94] : memref<108x128xbf16, #tpu.memory_space<vmem>>, vector<4x128xbf16>
      tpu.vector_store %arg8[%c72, %c0_94], %100 {strides = array<i32>} : memref<108x128xbf16, #tpu.memory_space<vmem>>, vector<4x128xbf16>,
      %c0_95 = arith.constant 0 : index
      %102 = arith.index_cast %97 : i32 to index
      %c0_96 = arith.constant 0 : index
      %c1_97 = arith.constant 1 : index
      %103 = vector.load %arg2[%c0_95, %102, %c0_96, %c1_97] : memref<1x6x4x150xbf16, #tpu.memory_space<vmem>>, vector<1x1x4x128xbf16>
      %104 = vector.shape_cast %103 : vector<1x1x4x128xbf16> to vector<4x128xbf16>
      %c76 = arith.constant 76 : index
      %c0_98 = arith.constant 0 : index
      %105 = vector.load %arg8[%c76, %c0_98] : memref<108x128xbf16, #tpu.memory_space<vmem>>, vector<4x128xbf16>
      tpu.vector_store %arg8[%c76, %c0_98], %104 {strides = array<i32>} : memref<108x128xbf16, #tpu.memory_space<vmem>>, vector<4x128xbf16>,
      %c0_99 = arith.constant 0 : index
      %106 = arith.index_cast %97 : i32 to index
      %c0_100 = arith.constant 0 : index
      %c2_101 = arith.constant 2 : index
      %107 = vector.load %arg2[%c0_99, %106, %c0_100, %c2_101] : memref<1x6x4x150xbf16, #tpu.memory_space<vmem>>, vector<1x1x4x128xbf16>
      %108 = vector.shape_cast %107 : vector<1x1x4x128xbf16> to vector<4x128xbf16>
      %c80 = arith.constant 80 : index
      %c0_102 = arith.constant 0 : index
      %109 = vector.load %arg8[%c80, %c0_102] : memref<108x128xbf16, #tpu.memory_space<vmem>>, vector<4x128xbf16>
      tpu.vector_store %arg8[%c80, %c0_102], %108 {strides = array<i32>} : memref<108x128xbf16, #tpu.memory_space<vmem>>, vector<4x128xbf16>,
      %c0_103 = arith.constant 0 : index
      %110 = arith.index_cast %97 : i32 to index
      %c0_104 = arith.constant 0 : index
      %c10_105 = arith.constant 10 : index
      %111 = vector.load %arg2[%c0_103, %110, %c0_104, %c10_105] : memref<1x6x4x150xbf16, #tpu.memory_space<vmem>>, vector<1x1x4x128xbf16>
      %112 = vector.shape_cast %111 : vector<1x1x4x128xbf16> to vector<4x128xbf16>
      %c84 = arith.constant 84 : index
      %c0_106 = arith.constant 0 : index
      %113 = vector.load %arg8[%c84, %c0_106] : memref<108x128xbf16, #tpu.memory_space<vmem>>, vector<4x128xbf16>
      tpu.vector_store %arg8[%c84, %c0_106], %112 {strides = array<i32>} : memref<108x128xbf16, #tpu.memory_space<vmem>>, vector<4x128xbf16>,
      %c0_107 = arith.constant 0 : index
      %114 = arith.index_cast %97 : i32 to index
      %c0_108 = arith.constant 0 : index
      %c11_109 = arith.constant 11 : index
      %115 = vector.load %arg2[%c0_107, %114, %c0_108, %c11_109] : memref<1x6x4x150xbf16, #tpu.memory_space<vmem>>, vector<1x1x4x128xbf16>
      %116 = vector.shape_cast %115 : vector<1x1x4x128xbf16> to vector<4x128xbf16>
      %c88 = arith.constant 88 : index
      %c0_110 = arith.constant 0 : index
      %117 = vector.load %arg8[%c88, %c0_110] : memref<108x128xbf16, #tpu.memory_space<vmem>>, vector<4x128xbf16>
      tpu.vector_store %arg8[%c88, %c0_110], %116 {strides = array<i32>} : memref<108x128xbf16, #tpu.memory_space<vmem>>, vector<4x128xbf16>,
      %c0_111 = arith.constant 0 : index
      %118 = arith.index_cast %97 : i32 to index
      %c0_112 = arith.constant 0 : index
      %c12_113 = arith.constant 12 : index
      %119 = vector.load %arg2[%c0_111, %118, %c0_112, %c12_113] : memref<1x6x4x150xbf16, #tpu.memory_space<vmem>>, vector<1x1x4x128xbf16>
      %120 = vector.shape_cast %119 : vector<1x1x4x128xbf16> to vector<4x128xbf16>
      %c92 = arith.constant 92 : index
      %c0_114 = arith.constant 0 : index
      %121 = vector.load %arg8[%c92, %c0_114] : memref<108x128xbf16, #tpu.memory_space<vmem>>, vector<4x128xbf16>
      tpu.vector_store %arg8[%c92, %c0_114], %120 {strides = array<i32>} : memref<108x128xbf16, #tpu.memory_space<vmem>>, vector<4x128xbf16>,
      %c0_115 = arith.constant 0 : index
      %122 = arith.index_cast %97 : i32 to index
      %c0_116 = arith.constant 0 : index
      %c20_117 = arith.constant 20 : index
      %123 = vector.load %arg2[%c0_115, %122, %c0_116, %c20_117] : memref<1x6x4x150xbf16, #tpu.memory_space<vmem>>, vector<1x1x4x128xbf16>
      %124 = vector.shape_cast %123 : vector<1x1x4x128xbf16> to vector<4x128xbf16>
      %c96 = arith.constant 96 : index
      %c0_118 = arith.constant 0 : index
      %125 = vector.load %arg8[%c96, %c0_118] : memref<108x128xbf16, #tpu.memory_space<vmem>>, vector<4x128xbf16>
      tpu.vector_store %arg8[%c96, %c0_118], %124 {strides = array<i32>} : memref<108x128xbf16, #tpu.memory_space<vmem>>, vector<4x128xbf16>,
      %c0_119 = arith.constant 0 : index
      %126 = arith.index_cast %97 : i32 to index
      %c0_120 = arith.constant 0 : index
      %c21_121 = arith.constant 21 : index
      %127 = vector.load %arg2[%c0_119, %126, %c0_120, %c21_121] : memref<1x6x4x150xbf16, #tpu.memory_space<vmem>>, vector<1x1x4x128xbf16>
      %128 = vector.shape_cast %127 : vector<1x1x4x128xbf16> to vector<4x128xbf16>
      %c100 = arith.constant 100 : index
      %c0_122 = arith.constant 0 : index
      %129 = vector.load %arg8[%c100, %c0_122] : memref<108x128xbf16, #tpu.memory_space<vmem>>, vector<4x128xbf16>
      tpu.vector_store %arg8[%c100, %c0_122], %128 {strides = array<i32>} : memref<108x128xbf16, #tpu.memory_space<vmem>>, vector<4x128xbf16>,
      %c0_123 = arith.constant 0 : index
      %130 = arith.index_cast %97 : i32 to index
      %c0_124 = arith.constant 0 : index
      %c22_125 = arith.constant 22 : index
      %131 = vector.load %arg2[%c0_123, %130, %c0_124, %c22_125] : memref<1x6x4x150xbf16, #tpu.memory_space<vmem>>, vector<1x1x4x128xbf16>
      %132 = vector.shape_cast %131 : vector<1x1x4x128xbf16> to vector<4x128xbf16>
      %c104 = arith.constant 104 : index
      %c0_126 = arith.constant 0 : index
      %133 = vector.load %arg8[%c104, %c0_126] : memref<108x128xbf16, #tpu.memory_space<vmem>>, vector<4x128xbf16>
      tpu.vector_store %arg8[%c104, %c0_126], %132 {strides = array<i32>} : memref<108x128xbf16, #tpu.memory_space<vmem>>, vector<4x128xbf16>,
      %c0_127 = arith.constant 0 : index
      %c0_128 = arith.constant 0 : index
      %134 = vector.load %arg8[%c0_127, %c0_128] : memref<108x128xbf16, #tpu.memory_space<vmem>>, vector<108x128xbf16>
      %cst_129 = arith.constant dense<0.000000e+00> : vector<8x128xf32>
      %135 = tpu.matmul %4, %134, %cst_129 {dimension_numbers = #tpu.dot_dimension_numbers<[1], [0], [0], [1], [0, 0, 1, 1], [], []>} : vector<8x108xbf16>, vector<108x128xbf16>, vector<8x128xf32> -> vector<8x128xf32>
      %c128_i32 = arith.constant 128 : i32
      %136 = arith.muli %arg9, %c128_i32 : i32
      %137 = tpu.assume_multiple %136, 128 : i32
      %c0_130 = arith.constant 0 : index
      %c0_131 = arith.constant 0 : index
      %138 = arith.index_cast %137 : i32 to index
      %139 = vector.load %arg5[%c0_130, %c0_131, %138] : memref<1x8x512xf32, #tpu.memory_space<vmem>>, vector<1x8x128xf32>
      %140 = vector.shape_cast %139 : vector<1x8x128xf32> to vector<8x128xf32>
      %141 = vector.shape_cast %135 : vector<8x128xf32> to vector<1x8x128xf32>
      tpu.vector_store %arg5[%c0_130, %c0_131, %138], %141 {strides = array<i32>} : memref<1x8x512xf32, #tpu.memory_space<vmem>>, vector<1x8x128xf32>,
      %142 = arith.cmpi slt, %arg9, %2 : i32
      %143 = arith.extui %142 : i1 to i32
      %144 = arith.sitofp %143 : i32 to f32
      %145 = vector.broadcast %3 : vector<1x128xf32> to vector<8x128xf32>
      %146 = arith.mulf %135, %145 : vector<8x128xf32>
      %147 = vector.shape_cast %146 : vector<8x128xf32> to vector<1x8x128xf32>
      %cst_132 = arith.constant dense<0.000000e+00> : vector<1xf32>
      %148 = vector.multi_reduction <add>, %147, %cst_132 [1, 2] : vector<1x8x128xf32> to vector<1xf32>
      %149 = vector.shape_cast %148 : vector<1xf32> to vector<1x1x1xf32>
      %150 = vector.extract %149[0, 0, 0] : f32 from vector<1x1x1xf32>
      %151 = arith.mulf %144, %150 : f32
      %152 = arith.addf %arg10, %151 : f32
      scf.yield %152 : f32
    }
    %c4_i32_5 = arith.constant 4 : i32
    %c512_i32 = arith.constant 512 : i32
    %7 = arith.muli %2, %c512_i32 : i32
    %8 = arith.sitofp %7 : i32 to f32
    %9 = arith.divf %6, %8 : f32
    %cst_6 = arith.constant 0.000000e+00 : f32
    %c0_i32_7 = arith.constant 0 : i32
    %c4_i32_8 = arith.constant 4 : i32
    %10 = arith.addi %c0_i32_7, %c4_i32_8 : i32
    %c1_i32_9 = arith.constant 1 : i32
    %11 = scf.for %arg9 = %c0_i32_7 to %10 step %c1_i32_9 iter_args(%arg10 = %cst_6) -> (f32)  : i32 {
      %c128_i32 = arith.constant 128 : i32
      %20 = arith.muli %arg9, %c128_i32 : i32
      %21 = tpu.assume_multiple %20, 128 : i32
      %c0_19 = arith.constant 0 : index
      %c0_20 = arith.constant 0 : index
      %22 = arith.index_cast %21 : i32 to index
      %23 = vector.load %arg5[%c0_19, %c0_20, %22] : memref<1x8x512xf32, #tpu.memory_space<vmem>>, vector<1x8x128xf32>
      %24 = vector.shape_cast %23 : vector<1x8x128xf32> to vector<8x128xf32>
      %25 = vector.broadcast %9 : f32 to vector<8x128xf32>
      %26 = arith.subf %24, %25 : vector<8x128xf32>
      %27 = vector.broadcast %3 : vector<1x128xf32> to vector<8x128xf32>
      %28 = arith.mulf %26, %27 : vector<8x128xf32>
      %29 = arith.cmpi slt, %arg9, %2 : i32
      %30 = arith.extui %29 : i1 to i32
      %31 = arith.sitofp %30 : i32 to f32
      %32 = arith.mulf %28, %28 : vector<8x128xf32>
      %33 = vector.shape_cast %32 : vector<8x128xf32> to vector<1x8x128xf32>
      %cst_21 = arith.constant dense<0.000000e+00> : vector<1xf32>
      %34 = vector.multi_reduction <add>, %33, %cst_21 [1, 2] : vector<1x8x128xf32> to vector<1xf32>
      %35 = vector.shape_cast %34 : vector<1xf32> to vector<1x1x1xf32>
      %36 = vector.extract %35[0, 0, 0] : f32 from vector<1x1x1xf32>
      %37 = arith.mulf %31, %36 : f32
      %38 = arith.addf %arg10, %37 : f32
      scf.yield %38 : f32
    }
    %c4_i32_10 = arith.constant 4 : i32
    %12 = vector.broadcast %6 : f32 to vector<1x128xf32>
    %c0_11 = arith.constant 0 : index
    %c0_12 = arith.constant 0 : index
    %c0_13 = arith.constant 0 : index
    %c0_14 = arith.constant 0 : index
    %13 = vector.load %arg6[%c0_11, %c0_12, %c0_13, %c0_14] : memref<1x1x1x128xf32, #tpu.memory_space<vmem>>, vector<1x1x1x128xf32>
    %14 = vector.shape_cast %13 : vector<1x1x1x128xf32> to vector<1x128xf32>
    %15 = vector.shape_cast %12 : vector<1x128xf32> to vector<1x1x1x128xf32>
    tpu.vector_store %arg6[%c0_11, %c0_12, %c0_13, %c0_14], %15 {strides = array<i32>} : memref<1x1x1x128xf32, #tpu.memory_space<vmem>>, vector<1x1x1x128xf32>,
    %16 = vector.broadcast %11 : f32 to vector<1x128xf32>
    %c0_15 = arith.constant 0 : index
    %c0_16 = arith.constant 0 : index
    %c0_17 = arith.constant 0 : index
    %c0_18 = arith.constant 0 : index
    %17 = vector.load %arg7[%c0_15, %c0_16, %c0_17, %c0_18] : memref<1x1x1x128xf32, #tpu.memory_space<vmem>>, vector<1x1x1x128xf32>
    %18 = vector.shape_cast %17 : vector<1x1x1x128xf32> to vector<1x128xf32>
    %19 = vector.shape_cast %16 : vector<1x128xf32> to vector<1x1x1x128xf32>
    tpu.vector_store %arg7[%c0_15, %c0_16, %c0_17, %c0_18], %19 {strides = array<i32>} : memref<1x1x1x128xf32, #tpu.memory_space<vmem>>, vector<1x1x1x128xf32>,
    return
  }
  func.func @transform_0(%arg0: i32, %arg1: i32) -> (i32, i32, i32, i32) {
    %c2_i32 = arith.constant 2 : i32
    %0 = arith.muli %arg0, %c2_i32 : i32
    %1 = arith.addi %0, %arg1 : i32
    %c0_i32 = arith.constant 0 : i32
    %c0_i32_0 = arith.constant 0 : i32
    %c0_i32_1 = arith.constant 0 : i32
    %c0_i32_2 = arith.constant 0 : i32
    return %1, %c0_i32, %c0_i32_0, %c0_i32_1 : i32, i32, i32, i32
  }
  func.func @transform_1(%arg0: i32, %arg1: i32) -> (i32, i32) {
    %c0_i32 = arith.constant 0 : i32
    %c0_i32_0 = arith.constant 0 : i32
    %c0_i32_1 = arith.constant 0 : i32
    return %c0_i32, %c0_i32_0 : i32, i32
  }
  func.func @transform_2(%arg0: i32, %arg1: i32) -> (i32, i32) {
    %c0_i32 = arith.constant 0 : i32
    %c0_i32_0 = arith.constant 0 : i32
    %c0_i32_1 = arith.constant 0 : i32
    return %c0_i32, %c0_i32_0 : i32, i32
  }
  func.func @transform_3(%arg0: i32, %arg1: i32) -> (i32, i32, i32) {
    %c0_i32 = arith.constant 0 : i32
    %c0_i32_0 = arith.constant 0 : i32
    return %arg0, %c0_i32, %arg1 : i32, i32, i32
  }
  func.func @transform_4(%arg0: i32, %arg1: i32) -> (i32, i32, i32, i32) {
    %c0_i32 = arith.constant 0 : i32
    %c0_i32_0 = arith.constant 0 : i32
    %c0_i32_1 = arith.constant 0 : i32
    return %arg0, %arg1, %c0_i32, %c0_i32_0 : i32, i32, i32, i32
  }
  func.func @transform_5(%arg0: i32, %arg1: i32) -> (i32, i32, i32, i32) {
    %c0_i32 = arith.constant 0 : i32
    %c0_i32_0 = arith.constant 0 : i32
    %c0_i32_1 = arith.constant 0 : i32
    return %arg0, %arg1, %c0_i32, %c0_i32_0 : i32, i32, i32, i32
  }
}

</mosaic_0001>

<bundles_post_ra>
// kernel: tpu_custom_call.1
= control target key start
LH: loop header
LB: loop body
LE: loop exit
PB: predicated region body
PF: predicated region fallthrough
CT: control target
= control target key end

     0   :  { %s2037_s0 = inlined_call_operand.hbm [shape: bf16[4,6,4,150], index: 0, kind: input, shape index: {}]   ;;  %s2038_s1 = inlined_call_operand.hbm [shape: bf16[8,108], index: 1, kind: input, shape index: {}]   ;;  %s2039_s2 = inlined_call_operand.vmem [shape: f32[1,128], index: 2, kind: input, shape index: {}]   ;;  %s2040_s3 = inlined_call_operand.hbm [shape: f32[2,8,1024], index: 3, kind: output, shape index: {0}]   ;;  %s2041_s4 = inlined_call_operand.hbm [shape: f32[2,2,1,128], index: 4, kind: output, shape index: {1}]   ;;  %s2042_s5 = inlined_call_operand.hbm [shape: f32[2,2,1,128], index: 5, kind: output, shape index: {2}]  }
   0x1   :  { %2060 = sst [smem:[#allocation24_spill]] %s2037_s0 }
   0x2   :  { %2061 = sst [smem:[#allocation25_spill]] %s2038_s1 }
   0x3   :  { %2062 = sst [smem:[#allocation26_spill]] %s2039_s2 }
   0x4   :  { %2063 = sst [smem:[#allocation27_spill]] %s2040_s3 }
   0x5   :  { %2064 = sst [smem:[#allocation28_spill]] %s2041_s4 }
   0x6   :  { %2065 = sst [smem:[#allocation29_spill]] %s2042_s5 }
   0x7   :  { %11 = vsyncpa [#allocation4], 0 }
   0x8   :  { %13 = vsyncpa [#allocation4 + $0x1], 0 }
   0x9   :  { %14 = vsyncpa [#allocation7], 0 }
   0xa   :  { %15 = vsyncpa [#allocation5], 0 }
   0xb   :  { %17 = vsyncpa [#allocation5 + $0x1], 0 }
   0xc   :  { %18 = vsyncpa [#allocation10], 0 }
   0xd   :  { %20 = vsyncpa [#allocation10 + $0x1], 0  ;;  %s1600_s18 = smov 0   ;;  %s1602_s19 = smov 0  }
   0xe   :  { %s1604_s20 = smov 0   ;;  %s1606_s21 = smov 0  }
   0xf   :  { %s1608_s22 = smov 0   ;;  %s1610_s23 = smov 0  }
  0x10   :  { %s1612_s24 = smov 0   ;;  %s1614_s25 = smov 0  }
  0x11   :  { %s1616_s26 = smov 0   ;;  %s1618_s27 = smov 0  }
  0x12   :  { %s1620_s28 = smov 0  }
  0x13 LB: > { %2066 = sst [smem:[#allocation16_spill]] %s1501_s18  ;;  %s1654_s29 = sadd.s32 4294967295, %s1541_s28   ;;  %s1541_s28 = sphi %s1620_s28, %s26_s28   ;;  %s1537_s27 = sphi %s1618_s27, %s2110_s27   ;;  %s1533_s26 = sphi %s1616_s26, %s2109_s26   ;;  %s1529_s25 = sphi %s1614_s25, %s2108_s25   ;;  %s1525_s24 = sphi %s1612_s24, %s2100_s24   ;;  %s1521_s23 = sphi %s1610_s23, %s2107_s23   ;;  %s1517_s22 = sphi %s1608_s22, %s2106_s22   ;;  %s1513_s21 = sphi %s1606_s21, %s2105_s21   ;;  %s1509_s20 = sphi %s1604_s20, %s2104_s20   ;;  %s1505_s19 = sphi %s1602_s19, %s2103_s19   ;;  %s1501_s18 = sphi %s1600_s18, %s2102_s18  }
  0x14   : > { %2067 = sst [smem:[#allocation17_spill]] %s1525_s24  ;;  %s2043_s30 = sadd.s32 4294967294, %s1541_s28  }
  0x15   : > { %2068 = sst [smem:[#allocation18_spill]] %s1529_s25  ;;  %p56_p0 = scmp.ne.s32.totalorder %s1521_s23, %s1517_s22 }
  0x16   : > { %2069 = sst [smem:[#allocation19_spill]] %s1533_s26  ;;  %p57_p1 = scmp.eq.s32.totalorder %s1541_s28, 0 }
  0x17   : > { %2070 = sst [smem:[#allocation20_spill]] %s1541_s28  ;;  %p62_p2 = scmp.ne.s32.totalorder %s1517_s22, %s1513_s21 }
  0x18   : > { %p63_p3 = scmp.eq.s32.totalorder %s1654_s29, 0  ;;  %p1662_p4 = por %p57_p1, %p56_p0 }
  0x19   : > { %p129_p6 = scmp.ne.s32.totalorder %s1509_s20, %s1505_s19  ;;  %p130_p7 = scmp.eq.s32.totalorder %s1654_s29, 3 }
  0x1a   : > { %p1669_p5 = por %p63_p3, %p62_p2  ;;  %p135_p8 = scmp.ne.s32.totalorder %s1505_s19, %s1501_s18 }
  0x1b   : > { %p136_p9 = scmp.eq.s32.totalorder %s2043_s30, 3  ;;  %p1022_p10 = scmp.ge.s32.totalorder %s1541_s28, 1 }
  0x1c   : > { %p1681_p11 = por %p130_p7, %p129_p6  ;;  %p199_p12 = scmp.lt.s32.totalorder %s1541_s28, 5 }
  0x1d   : > { %p1686_p13 = por %p136_p9, %p135_p8  ;;  %s2078_s1 = sld [smem:[#allocation25_spill]] }
  0x1e   : > { %s2073_s9 = scalar_select %p1681_p11, 1, 0 }
  0x1f   : > { %s2075_s10 = scalar_select %p1686_p13, 1, 0 }
  0x20   : > { %2074 = sst [smem:[#allocation21_spill]] %s2073_s9  ;;  %p1690_p0 = pnand %p1022_p10, %p199_p12 }
  0x21   : > { %2076 = sst [smem:[#allocation22_spill]] %s2075_s10  ;;  %s1559_s15 = smov [#allocation6]  }
  0x22   : > { %p1124_p1 = pneg %p1690_p0  ;;  %s213_s16 = sshll.u32 %s1559_s15, 4  ;;  %s214_s16 = int_to_ptr.vmem [resolvable:$true] %s213_s16 }
  0x23   : > { %s211_s14 = sshll.u32 %s2078_s1, 4  ;;  %p1143_p6 = scmp.lt.s32.totalorder %s1541_s28, 4  ;;  %s212_s14 = int_to_ptr.hbm [resolvable:$true] %s211_s14 }
  0x24   : > { %p1125_p2 = pnand %p1124_p1, %p63_p3  ;;  %s38_s21 = sadd.s32 1, %s1537_s27 }
  0x25   : > { %p1704_p7 = pnand %p1143_p6, %p1662_p4  ;;  %s35_s12 = sadd.s32 1, %s1533_s26 }
  0x26   : > { %1127 = dma.hbm_to_vmem [thread:$0]  (!%p1125_p2), %s212_s14, 64, %s214_s16, [#allocation7]  }
  0x27   : > { %s1020_s13 = sshll.u32 %s1537_s27, 1  ;;  %p36_p8 = scmp.ge.s32.totalorder %s35_s12, 2 }
  0x28   : > { %s43_s30 = sadd.s32 %s1533_s26, %s1020_s13  ;;  %s49_s7 = sadd.s32 1, %s1521_s23 }
  0x29   : > { %s227_s1 = sand.u32 1, %s1521_s23   ;;  %s2112_s12 = smov (%p36_p8, %s35_s12), 0 }
  0x2a   : > { %s2114_s21 = smov (!%p36_p8, %s38_s21), %s1537_s27  ;;  %s115_s6 = ssub.s32 %s1533_s26, %s2112_s12 }
  0x2b   : > { %p40_p4 = scmp.ge.s32.totalorder %s2114_s21, 2  ;;  %s1103_s15 = smul.u32 24, %s227_s1 }
  0x2c   : > { %s1104_s14 = smul.u32 24, %s43_s30  ;;  %s2081_s0 = sld [smem:[#allocation24_spill]] }
  0x2d   : > { %s2116_s21 = smov (%p40_p4, %s2114_s21), 0  ;;  %s2082_s9 = sadd.s32 1, %s1509_s20 }
  0x2e   : > { %2080 = sst [smem:[#allocation23_spill]] %s2116_s21  ;;  %s1021_s18 = sshll.u32 %s2116_s21, 1 }
  0x2f   : > { %s114_s28 = ssub.s32 %s1537_s27, %s2116_s21  ;;  %s45_s3 = sadd.s32 %s1021_s18, %s2112_s12 }
  0x30   : > { %s116_s5 = sor.u32 %s115_s6, %s114_s28  ;;  %s46_s4 = ssub.s32 %s43_s30, %s45_s3 }
  0x31   : > { %p117_p9 = scmp.eq.s32.totalorder %s116_s5, 0  ;;  %p47_p10 = scmp.eq.s32.totalorder %s46_s4, 0 }
  0x32   : > { %s238_s13 = scalar_lea.hbm %s2081_s0, %s1104_s14  ;;  %s231_s24 = scalar_lea.vmem [#allocation3], %s1103_s15 }
  0x33   : > { %s239_s26 = sshll.u32 %s238_s13, 4  ;;  %s241_s10 = sshll.u32 %s231_s24, 4  ;;  %s240_s26 = int_to_ptr.hbm [resolvable:$true] %s239_s26  ;;  %s242_s10 = int_to_ptr.vmem [resolvable:$true] %s241_s10 }
  0x34   : > { %s1731_s25 = scalar_select %p117_p9, %s1509_s20, %s2082_s9  }
  0x35   : > { %s1734_s2 = scalar_select %p47_p10, %s1521_s23, %s49_s7  }
  0x36   : > { %s228_s16 = scalar_lea.sflag [#allocation4], %s227_s1  ;;  %s1560_s14 = smov 64  }
  0x37   : > { %s1561_s0 = smov 4   ;;  %253 = sbr.rel (%p1690_p0) target bundleno = 990 (0x3de), region = 32 }
  0x38   : > { %1131 = dma.hbm_to_vmem [thread:$0]  (!%p1704_p7), %s240_s26, 384, %s242_s10, %s228_s16, %s1560_s14, %s1560_s14, %s1561_s0  }
  0x39   : > { %s255_s3 = sand.u32 (!%p1690_p0), 1, %s1517_s22  }
  0x3a   : > { %s1741_s4 = smul.u32 (!%p1690_p0), 24, %s255_s3  ;;  %s256_s5 = scalar_lea.sflag (!%p1690_p0), [#allocation4], %s255_s3 }
  0x3c   : > { %s259_s18 = scalar_lea.vmem [#allocation3], %s1741_s4 }
  0x3d   : > { %1484 = dma.done.wait (%p1669_p5), %s256_s5, 384  }
  0x3e   : > { %1486 = vsyncadd (%p1669_p5), %s256_s5, 4294966912 }
  0x3f   : > { %1488 = dma.done.wait (%p63_p3), [#allocation7], 64  }
  0x40   : > { %1490 = vsyncadd (%p63_p3), [#allocation7], 4294967232  ;;  %s2083_s0 = sld [smem:[#allocation17_spill]]  ;;  %s1753_s1 = sand.u32 1, %s1505_s19   ;;  %v1766_v1 = vld [vmem:[#allocation6] sm:$0xf] }
  0x41   : > { %s1029_s26 = sshll.u32 %s1753_s1, 5  ;;  %s2084_s8 = sld [smem:[#allocation26_spill]] }
  0x42   : > { %s1768_s9 = scalar_lea.vmem [#allocation8], %s1029_s26  ;;  %s293_s11 = scalar_lea.vmem [#allocation9], %s1753_s1 }
  0x43   : > { %s299_s17 = scalar_lea.vmem [#allocation11], %s1753_s1  ;;  %s1772_s6 = smov 0.0  }
  0x44   : > { %s1774_s15 = smov 0  }
  0x46   : > { %s2057_s24 = sshll.u32 %s2083_s0, 2 }
  0x47   : > { %s305_s28 = ssub.s32 8, %s2057_s24  ;;  %v1764_v0 = vld [vmem:[%s2084_s8] sm:$0x1] }
  0x48   : > { %p306_p12 = scmp.lt.s32.totalorder %s305_s28, 4 }
  0x4a   : > { %s2118_s28 = smov (!%p306_p12, %s305_s28), 4 }
  0x4b LB: >> { %s1095_s13 = sshll.u32 %s1549_s15, 2  ;;  %s1562_s16 = smov 118   ;;  %vm368_vm0 = vcmask 957440   ;;  %vm356_vm1 = vcmask 965632   ;;  %vm418_vm2 = vcmask 867328   ;;  %vm406_vm3 = vcmask 875520   ;;  %s1549_s15 = sphi %s1774_s15, %s315_s15   ;;  %s1545_s6 = sphi %s1772_s6, %s2086_s6  }
  0x4c   : >> { %s1785_s10 = scalar_lea.vmem %s259_s18, %s1095_s13 [#allocation3]  ;;  %s1563_s14 = smov 117   ;;  %vm331_vm4 = vcmask 1039360   ;;  %vm343_vm5 = vcmask 1031168   ;;  %vm381_vm6 = vcmask 949248   ;;  %vm393_vm7 = vcmask 883712  }
  0x4d   : >> { %v322_v2 = vld [vmem:[%s1785_s10] sm:$0xf]  ;;  %v1034_v17 = vld [vmem:[%s1785_s10 + $0x4] sm:$0x3]  ;;  %s1564_s3 = smov 107   ;;  %s1565_s5 = smov 106  }
  0x4e   : >> { %325 = vst [vmem:[#allocation1 + $0x1] ss:$2 sm:$0xff] %v322_v2  ;;  %v335_v3 = vld [vmem:[%s1785_s10] sm:$0xf]  ;;  %v1035_v19 = vld [vmem:[%s1785_s10 + $0x4] sm:$0xf]  ;;  %p705_p3 = scmp.lt.s32.totalorder %s1549_s15, %s2118_s28 }
  0x4f   : >> { %v347_v5 = vld [vmem:[%s1785_s10] sm:$0xf]  ;;  %v1036_v21 = vld [vmem:[%s1785_s10 + $0x4] sm:$0xf]  ;;  %v1045_v35 = vld [vmem:[%s1785_s10 + $0x8] sm:$0xf] }
  0x50   : >> { %v360_v7 = vld [vmem:[%s1785_s10] sm:$0xf]  ;;  %v1037_v23 = vld [vmem:[%s1785_s10 + $0x4] sm:$0xf]  ;;  %v1046_v37 = vld [vmem:[%s1785_s10 + $0x8] sm:$0xf] }
  0x51   : >> { %v372_v9 = vld [vmem:[%s1785_s10] sm:$0xf]  ;;  %v1038_v25 = vld [vmem:[%s1785_s10 + $0x4] sm:$0xf]  ;;  %s1566_s0 = smov 127   ;;  %s1567_s26 = smov 126  }
  0x52   : >> { %v385_v11 = vld [vmem:[%s1785_s10] sm:$0xf]  ;;  %v1039_v27 = vld [vmem:[%s1785_s10 + $0x4] sm:$0xf]  ;;  %v1047_v39 = vld [vmem:[%s1785_s10 + $0x8] sm:$0xf] }
  0x53   : >> { %v397_v13 = vld [vmem:[%s1785_s10] sm:$0xf]  ;;  %v1040_v29 = vld [vmem:[%s1785_s10 + $0x4] sm:$0xf]  ;;  %v1048_v41 = vld [vmem:[%s1785_s10 + $0x8] sm:$0xf] }
  0x54   : >> { %v410_v15 = vld [vmem:[%s1785_s10] sm:$0xf]  ;;  %v1041_v31 = vld [vmem:[%s1785_s10 + $0x4] sm:$0xf]  ;;  %v1049_v43 = vld [vmem:[%s1785_s10 + $0x8] sm:$0xf] }
  0x55   : >> { %v1789_v4 = vld.sshfl [vmem:[#allocation1] sm:$0xff pattern:$0x75643120]  ;;  %v1050_v45 = vld [vmem:[%s1785_s10 + $0x8] sm:$0xf]  ;;  %s1568_s30 = smov 116  }
  0x56   : >> { %337 = vst [vmem:[#allocation1] ss:$2 sm:$0xff] %v335_v3  ;;  %v1042_v33 = vld [vmem:[%s1785_s10 + $0x4] sm:$0xf]  ;;  %v1051_v47 = vld [vmem:[%s1785_s10 + $0x8] sm:$0xf] }
  0x57   : >> { %s1569_s7 = smov 108   ;;  %v1052_v49 = vld [vmem:[%s1785_s10 + $0x8] sm:$0xf]  ;;  %vm682_vm8 = vcmask 1045504   ;;  %s1082_s8 = sshll.u32 %s1549_s15, 7 }
  0x58   : >> { %s700_s13 = sshra.s32 %s1082_s8, 7  ;;  %s315_s15 = sadd.s32 1, %s1549_s15  }
  0x59   : >> { %p312_p5 = scmp.ge.s32.totalorder %s315_s15, 4  }
  0x5a   : > { %s1911_s15 = smov (%p312_p5), 0  }
  0x5d   : >> { %v1792_v6 = vld.sshfl [vmem:[#allocation1] sm:$0xff pattern:$0x75643120] }
  0x5e   : >> { %350 = vst [vmem:[#allocation1 + $0x1] ss:$2 sm:$0xff] %v347_v5 }
  0x65   : >> { %v1795_v8 = vld.sshfl [vmem:[#allocation1] sm:$0xff pattern:$0x75643120] }
  0x66   : >> { %362 = vst [vmem:[#allocation1] ss:$2 sm:$0xff] %v360_v7 }
  0x6d   : >> { %v1798_v10 = vld.sshfl [vmem:[#allocation1] sm:$0xff pattern:$0x75643120] }
  0x6e   : >> { %375 = vst [vmem:[#allocation1 + $0x1] ss:$2 sm:$0xff] %v372_v9 }
  0x75   : >> { %v1801_v12 = vld.sshfl [vmem:[#allocation1] sm:$0xff pattern:$0x75643120] }
  0x76   : >> { %387 = vst [vmem:[#allocation1] ss:$2 sm:$0xff] %v385_v11 }
  0x7d   : >> { %v1804_v14 = vld.sshfl [vmem:[#allocation1] sm:$0xff pattern:$0x75643120] }
  0x7e   : >> { %400 = vst [vmem:[#allocation1 + $0x1] ss:$2 sm:$0xff] %v397_v13 }
  0x85   : >> { %v1807_v16 = vld.sshfl [vmem:[#allocation1] sm:$0xff pattern:$0x75643120] }
  0x86   : >> { %412 = vst [vmem:[#allocation1] ss:$2 sm:$0xff] %v410_v15 }
  0x8d   : >> { %v413_v18 = vld.sshfl [vmem:[#allocation1] sm:$0xff pattern:$0x75643120] }
  0x8e   : >> { %429 = vst [vmem:[#allocation1 + $0x1] ss:$2 sm:$0xff] %v1034_v17 }
  0x95   : >> { %v430_v20 = vld.sshfl [vmem:[#allocation1] sm:$0xff pattern:$0x75643120] }
  0x96   : >> { %435 = vst [vmem:[#allocation1] ss:$2 sm:$0xff] %v1035_v19 }
  0x97   : >> { %432 = vst [vmem:[#allocation2 + $0x10] sm:$0xc] %v430_v20 }
  0x9d   : >> { %v1812_v22 = vld.sshfl [vmem:[#allocation1] sm:$0xff pattern:$0x75643120] }
  0x9e   : >> { %447 = vst [vmem:[#allocation1 + $0x1] ss:$2 sm:$0xff] %v1036_v21 }
  0xa5   : >> { %v1815_v24 = vld.sshfl [vmem:[#allocation1] sm:$0xff pattern:$0x75643120] }
  0xa6   : >> { %458 = vst [vmem:[#allocation1] ss:$2 sm:$0xff] %v1037_v23 }
  0xad   : >> { %v459_v26 = vld.sshfl [vmem:[#allocation1] sm:$0xff pattern:$0x75643120] }
  0xae   : >> { %461 = vrot.lane.b32.xlu1 %v459_v26, %s1562_s16  ;;  %470 = vst [vmem:[#allocation1 + $0x1] ss:$2 sm:$0xff] %v1038_v25 }
  0xb5   : >> { %v471_v28 = vld.sshfl [vmem:[#allocation1] sm:$0xff pattern:$0x75643120] }
  0xb6   : >> { %481 = vst [vmem:[#allocation1] ss:$2 sm:$0xff] %v1039_v27  ;;  %473 = vrot.lane.b32.xlu2 %v471_v28, %s1563_s14 }
  0xbd   : >> { %v482_v30 = vld.sshfl [vmem:[#allocation1] sm:$0xff pattern:$0x75643120] }
  0xbe   : >> { %493 = vst [vmem:[#allocation1 + $0x1] ss:$2 sm:$0xff] %v1040_v29 }
  0xc5   : >> { %v494_v32 = vld.sshfl [vmem:[#allocation1] sm:$0xff pattern:$0x75643120] }
  0xc6   : >> { %504 = vst [vmem:[#allocation1] ss:$2 sm:$0xff] %v1041_v31 }
  0xcd   : >> { %v505_v34 = vld.sshfl [vmem:[#allocation1] sm:$0xff pattern:$0x75643120] }
  0xce   : >> { %516 = vst [vmem:[#allocation1 + $0x1] ss:$2 sm:$0xff] %v1042_v33  ;;  %507 = vrot.lane.b32.xlu1 %v505_v34, %s1564_s3 }
  0xd5   : >> { %v517_v36 = vld.sshfl [vmem:[#allocation1] sm:$0xff pattern:$0x75643120] }
  0xd6   : >> { %534 = vst [vmem:[#allocation1 + $0x1] ss:$2 sm:$0xff] %v1045_v35  ;;  %519 = vrot.lane.b32.xlu2 %v517_v36, %s1565_s5 }
  0xdd   : >> { %v535_v38 = vld.sshfl [vmem:[#allocation1] sm:$0xff pattern:$0x75643120] }
  0xde   : >> { %537 = vrot.lane.b32.xlu0 %v535_v38, %s1566_s0  ;;  %545 = vst [vmem:[#allocation1] ss:$2 sm:$0xff] %v1046_v37 }
  0xe5   : >> { %v546_v40 = vld.sshfl [vmem:[#allocation1] sm:$0xff pattern:$0x75643120] }
  0xe6   : >> { %557 = vst [vmem:[#allocation1 + $0x1] ss:$2 sm:$0xff] %v1047_v39  ;;  %548 = vrot.lane.b32.xlu1 %v546_v40, %s1567_s26 }
  0xed   : >> { %v558_v42 = vld.sshfl [vmem:[#allocation1] sm:$0xff pattern:$0x75643120] }
  0xee   : >> { %568 = vst [vmem:[#allocation1] ss:$2 sm:$0xff] %v1048_v41  ;;  %560 = vrot.lane.b32.xlu2 %v558_v42, %s1562_s16  ;;  %v320_v42 = vld [vmem:[%s1785_s10] sm:$0x3] }
  0xef   : >> { %321 = vst [vmem:[#allocation2] sm:$0x3] %v320_v42 }
  0xf5   : >> { %v569_v44 = vld.sshfl [vmem:[#allocation1] sm:$0xff pattern:$0x75643120] }
  0xf6   : >> { %580 = vst [vmem:[#allocation1 + $0x1] ss:$2 sm:$0xff] %v1049_v43  ;;  %571 = vrot.lane.b32.xlu2 %v569_v44, %s1563_s14 }
  0xfd   : >> { %v581_v46 = vld.sshfl [vmem:[#allocation1] sm:$0xff pattern:$0x75643120] }
  0xfe   : >> { %583 = vrot.lane.b32.xlu0 %v581_v46, %s1568_s30  ;;  %591 = vst [vmem:[#allocation1] ss:$2 sm:$0xff] %v1050_v45  ;;  %415 = vrot.lane.b32.xlu2 %v413_v18, %s1565_s5 }
 0x105   : >> { %v592_v48 = vld.sshfl [vmem:[#allocation1] sm:$0xff pattern:$0x75643120] }
 0x106   : >> { %594 = vrot.lane.b32.xlu0 %v592_v48, %s1569_s7  ;;  %603 = vst [vmem:[#allocation1 + $0x1] ss:$2 sm:$0xff] %v1051_v47  ;;  %365 = vrot.lane.b32.xlu2 %v1798_v10, %s1563_s14  ;;  %s706_s14 = scalar_select %p705_p3, 1, 0 }
 0x10d   : >> { %v604_v50 = vld.sshfl [vmem:[#allocation1] sm:$0xff pattern:$0x75643120] }
 0x10e   : >> { %606 = vrot.lane.b32.xlu0 %v604_v50, %s1564_s3  ;;  %614 = vst [vmem:[#allocation1] ss:$2 sm:$0xff] %v1052_v49  ;;  %403 = vrot.lane.b32.xlu2 %v1807_v16, %s1564_s3  ;;  %s707_s3 = scvt.s32.f32 %s706_s14 }
 0x110   : >> { %v474_v52 = vpop.permute.xlu2 %473 }
 0x111   : >> { %v475_v53 = vrot.slane %v474_v52, 4 }
 0x113   : >> { %v476_v54 = vsel %vm368_vm0, %v474_v52, %v475_v53 }
 0x114   : >> { %478 = vst [vmem:[#allocation2 + $0x18] sm:$0xc] %v476_v54 }
 0x115   : >> { %v615_v51 = vld.sshfl [vmem:[#allocation1] sm:$0xff pattern:$0x75643120] }
 0x116   : >> { %484 = vrot.lane.b32.xlu0 %v482_v30, %s1568_s30  ;;  %617 = vrot.lane.b32.xlu1 %v615_v51, %s1565_s5 }
 0x117   : >> { %353 = vrot.lane.b32.xlu2 %v1795_v8, %s1562_s16  ;;  %v1044_v8 = vld [vmem:[%s1785_s10 + $0x8] sm:$0x3]  ;;  %s1083_s10 = sshll.u32 %s700_s13, 3 }
 0x118   : >> { %530 = vst [vmem:[#allocation2 + $0x24] sm:$0x3] %v1044_v8  ;;  %s703_s16 = scalar_lea.vmem %s1768_s9, %s1083_s10 [#allocation8] }
 0x11e   : >> { %438 = vrot.lane.b32.xlu0 %v1812_v22, %s1566_s0  ;;  %496 = vrot.lane.b32.xlu1 %v494_v32, %s1569_s7 }
 0x120   : >> { %v462_v55 = vpop.permute.xlu1 %461 }
 0x121   : >> { %v463_v56 = vrot.slane %v462_v55, 4 }
 0x123   : >> { %v464_v57 = vsel %vm356_vm1, %v462_v55, %v463_v56 }
 0x124   : >> { %466 = vst [vmem:[#allocation2 + $0x18] sm:$0x3] %v464_v57 }
 0x126   : >> { %378 = vrot.lane.b32.xlu0 %v1801_v12, %s1568_s30  ;;  %450 = vrot.lane.b32.xlu1 %v1815_v24, %s1567_s26  ;;  %s1084_s30 = sshll.u32 (%p312_p5), %s2118_s28, 9 }
 0x12e   : >> { %390 = vrot.lane.b32.xlu1 %v1804_v14, %s1569_s7  ;;  %328 = vrot.lane.b32.xlu0 %v1789_v4, %s1566_s0  ;;  %s724_s7 = scvt.s32.f32 (%p312_p5), %s1084_s30 }
 0x130   : >> { %v520_v58 = vpop.permute.xlu2 %519 }
 0x131   : >> { %v521_v59 = vrot.slane %v520_v58, 4 }
 0x133   : >> { %v522_v60 = vsel %vm418_vm2, %v520_v58, %v521_v59 }
 0x134   : >> { %524 = vst [vmem:[#allocation2 + $0x20] sm:$0xc] %v522_v60 }
 0x136   : >> { %340 = vrot.lane.b32.xlu1 %v1792_v6, %s1567_s26 }
 0x140   : >> { %v508_v61 = vpop.permute.xlu1 %507 }
 0x141   : >> { %v509_v62 = vrot.slane %v508_v61, 4 }
 0x143   : >> { %v510_v63 = vsel %vm406_vm3, %v508_v61, %v509_v62 }
 0x144   : >> { %512 = vst [vmem:[#allocation2 + $0x20] sm:$0x3] %v510_v63 }
 0x148   : >> { %v561_v2 = vpop.permute.xlu2 %560 }
 0x149   : >> { %v562_v3 = vrot.slane %v561_v2, 4 }
 0x14b   : >> { %v563_v4 = vsel %vm356_vm1, %v561_v2, %v562_v3 }
 0x14c   : >> { %565 = vst [vmem:[#allocation2 + $0x28] sm:$0xc] %v563_v4 }
 0x150   : >> { %v538_v5 = vpop.permute.xlu0 %537  ;;  %v572_v6 = vpop.permute.xlu2 %571 }
 0x151   : >> { %v539_v7 = vrot.slane %v538_v5, 4  ;;  %v573_v10 = vrot.slane %v572_v6, 4 }
 0x153   : >> { %v540_v9 = vsel %vm331_vm4, %v538_v5, %v539_v7  ;;  %v574_v11 = vsel %vm368_vm0, %v572_v6, %v573_v10 }
 0x154   : >> { %542 = vst [vmem:[#allocation2 + $0x24] sm:$0xc] %v540_v9 }
 0x155   : >> { %576 = vst [vmem:[#allocation2 + $0x2c] sm:$0x3] %v574_v11 }
 0x158   : >> { %v549_v12 = vpop.permute.xlu1 %548  ;;  %v416_v15 = vpop.permute.xlu2 %415 }
 0x159   : >> { %v550_v13 = vrot.slane %v549_v12, 4  ;;  %v417_v16 = vrot.slane %v416_v15, 4 }
 0x15b   : >> { %v551_v14 = vsel %vm343_vm5, %v549_v12, %v550_v13  ;;  %v419_v18 = vsel %vm418_vm2, %v416_v15, %v417_v16  ;;  %v1100_v60 = vld [vmem:[#allocation2 + $0x20] sm:$0xff]  ;;  %v709_v12 = vperm.slane %v1764_v0, 0 }
 0x15c   : >> { %553 = vst [vmem:[#allocation2 + $0x28] sm:$0x3] %v551_v14 }
 0x15d   : >> { %421 = vst [vmem:[#allocation2 + $0x10] sm:$0x3] %v419_v18 }
 0x160   : >> { %v366_v21 = vpop.permute.xlu2 %365 }
 0x161   : >> { %v367_v22 = vrot.slane %v366_v21, 4 }
 0x163   : >> { %v369_v24 = vsel %vm368_vm0, %v366_v21, %v367_v22 }
 0x164   : >> { %371 = vst [vmem:[#allocation2 + $0x8] sm:$0x3] %v369_v24 }
 0x168   : >> { %v404_v27 = vpop.permute.xlu2 %403 }
 0x169   : >> { %v405_v28 = vrot.slane %v404_v27, 4 }
 0x16b   : >> { %v407_v30 = vsel %vm406_vm3, %v404_v27, %v405_v28 }
 0x16c   : >> { %409 = vst [vmem:[#allocation2 + $0xc] sm:$0xc] %v407_v30 }
 0x170   : >> { %v584_v17 = vpop.permute.xlu0 %583 }
 0x171   : >> { %v585_v19 = vrot.slane %v584_v17, 4  ;;  %v354_v33 = vpop.permute.xlu2 %353 }
 0x172   : >> { %v355_v34 = vrot.slane %v354_v33, 4 }
 0x173   : >> { %v586_v20 = vsel %vm381_vm6, %v584_v17, %v585_v19 }
 0x174   : >> { %588 = vst [vmem:[#allocation2 + $0x2c] sm:$0xc] %v586_v20  ;;  %v357_v37 = vsel %vm356_vm1, %v354_v33, %v355_v34 }
 0x175   : >> { %359 = vst [vmem:[#allocation2 + $0x4] sm:$0xc] %v357_v37 }
 0x178   : >> { %v595_v23 = vpop.permute.xlu0 %594 }
 0x179   : >> { %v596_v25 = vrot.slane %v595_v23, 4 }
 0x17b   : >> { %v597_v26 = vsel %vm393_vm7, %v595_v23, %v596_v25  ;;  %v1101_v57 = vld [vmem:[#allocation2 + $0x28] sm:$0xff]  ;;  %v725_v23 = vstv (%p312_p5), %s724_s7 }
 0x17c   : >> { %599 = vst [vmem:[#allocation2 + $0x30] sm:$0x3] %v597_v26  ;;  %1277 = vrcp.f32 (%p312_p5), %v725_v23  ;;  %v737_v26 = vand.u32 (%p312_p5), 2147483648, %v725_v23  ;;  %vm731_vm9 = vweird.f32 (%p312_p5), %v725_v23  ;;  %v735_v28 = vand.u32 (%p312_p5), 2147483647, %v725_v23 }
 0x17e   : > { %v738_v30 = vor.u32 (%p312_p5), 1.1754944e-38, %v737_v26  ;;  %vm736_vm12 = vcmp.eq.f32.partialorder (%p312_p5), %v735_v28, 8.507059e+37 }
 0x180   : >> { %v607_v29 = vpop.permute.xlu0 %606 }
 0x181   : >> { %v608_v31 = vrot.slane %v607_v29, 4 }
 0x182   : > { %v1278_v24 = vpop.eup (%p312_p5), %1277 }
 0x183   : >> { %v609_v32 = vsel %vm406_vm3, %v607_v29, %v608_v31  ;;  %v727_v25 = vmul.f32 (%p312_p5), %v1278_v24, %v725_v23  ;;  %vm732_vm10 = vweird.f32 (%p312_p5), %v1278_v24 }
 0x184   : >> { %611 = vst [vmem:[#allocation2 + $0x30] sm:$0xc] %v609_v32  ;;  %vm733_vm11 = vmor (%p312_p5), %vm731_vm9, %vm732_vm10 }
 0x185   : > { %v728_v27 = vsub.f32 (%p312_p5), 1.0, %v727_v25 }
 0x187   : > { %v729_v29 = vmul.f32 (%p312_p5), %v1278_v24, %v728_v27 }
 0x188   : >> { %v485_v35 = vpop.permute.xlu0 %484  ;;  %v618_v36 = vpop.permute.xlu1 %617 }
 0x189   : >> { %v486_v38 = vrot.slane %v485_v35, 4  ;;  %v619_v39 = vrot.slane %v618_v36, 4  ;;  %v730_v31 = vadd.f32 (%p312_p5), %v1278_v24, %v729_v29 }
 0x18b   : >> { %v487_v40 = vsel %vm381_vm6, %v485_v35, %v486_v38  ;;  %v620_v41 = vsel %vm418_vm2, %v618_v36, %v619_v39  ;;  %v1079_v49 = vld [vmem:[#allocation2 + $0x30] sm:$0xf]  ;;  %v734_v32 = vsel (%p312_p5), %vm733_vm11, %v1278_v24, %v730_v31 }
 0x18c   : >> { %489 = vst [vmem:[#allocation2 + $0x1c] sm:$0x3] %v487_v40  ;;  %v739_v33 = vsel (%p312_p5), %vm736_vm12, %v738_v30, %v734_v32 }
 0x18d   : >> { %622 = vst [vmem:[#allocation2 + $0x34] sm:$0x3] %v620_v41 }
 0x190   : >> { %v439_v43 = vpop.permute.xlu0 %438  ;;  %v497_v44 = vpop.permute.xlu1 %496 }
 0x191   : >> { %v440_v45 = vrot.slane %v439_v43, 4  ;;  %v498_v46 = vrot.slane %v497_v44, 4 }
 0x193   : >> { %v441_v47 = vsel %vm331_vm4, %v439_v43, %v440_v45  ;;  %v499_v48 = vsel %vm393_vm7, %v497_v44, %v498_v46 }
 0x194   : >> { %443 = vst [vmem:[#allocation2 + $0x14] sm:$0x3] %v441_v47  ;;  %v1102_v50 = vld [vmem:[#allocation2 + $0x30] sm:$0x30] }
 0x195   : >> { %501 = vst [vmem:[#allocation2 + $0x1c] sm:$0xc] %v499_v48  ;;  %v1080_v51 = vor.u32 %v1102_v50, %v1079_v49 }
 0x197   : >> { %v684_v52 = vsel %vm682_vm8, %v1080_v51, 0 }
 0x198   : >> { %687 = vmatpush.bf16.msra.mxu0 %v684_v52  ;;  %v379_v53 = vpop.permute.xlu0 %378  ;;  %v451_v54 = vpop.permute.xlu1 %450 }
 0x199   : >> { %v380_v55 = vrot.slane %v379_v53, 4  ;;  %v452_v56 = vrot.slane %v451_v54, 4 }
 0x19b   : >> { %v382_v58 = vsel %vm381_vm6, %v379_v53, %v380_v55  ;;  %v453_v59 = vsel %vm343_vm5, %v451_v54, %v452_v56 }
 0x19c   : >> { %384 = vst [vmem:[#allocation2 + $0x8] sm:$0xc] %v382_v58  ;;  %688 = vmatpush.bf16.msra.mxu0 %v1101_v57  ;;  %v1099_v3 = vld [vmem:[#allocation2 + $0x18] sm:$0xff] }
 0x19d   : >> { %455 = vst [vmem:[#allocation2 + $0x14] sm:$0xc] %v453_v59 }
 0x1a0   : >> { %689 = vmatpush.bf16.msra.mxu0 %v1100_v60  ;;  %v391_v61 = vpop.permute.xlu1 %390  ;;  %v329_v62 = vpop.permute.xlu0 %328 }
 0x1a1   : >> { %v392_v63 = vrot.slane %v391_v61, 4  ;;  %v330_v2 = vrot.slane %v329_v62, 4 }
 0x1a3   : >> { %v394_v4 = vsel %vm393_vm7, %v391_v61, %v392_v63  ;;  %v332_v5 = vsel %vm331_vm4, %v329_v62, %v330_v2 }
 0x1a4   : >> { %396 = vst [vmem:[#allocation2 + $0xc] sm:$0x3] %v394_v4  ;;  %690 = vmatpush.bf16.msra.mxu0 %v1099_v3  ;;  %v1098_v7 = vld [vmem:[#allocation2 + $0x10] sm:$0xff] }
 0x1a5   : >> { %334 = vst [vmem:[#allocation2] sm:$0xc] %v332_v5 }
 0x1a8   : >> { %691 = vmatpush.bf16.msra.mxu0 %v1098_v7  ;;  %v341_v8 = vpop.permute.xlu1 %340 }
 0x1a9   : >> { %v342_v9 = vrot.slane %v341_v8, 4 }
 0x1ab   : >> { %v344_v6 = vsel %vm343_vm5, %v341_v8, %v342_v9  ;;  %v1097_v10 = vld [vmem:[#allocation2 + $0x8] sm:$0xff] }
 0x1ac   : >> { %346 = vst [vmem:[#allocation2 + $0x4] sm:$0x3] %v344_v6  ;;  %692 = vmatpush.bf16.msra.mxu0 %v1097_v10 }
 0x1b3   : >> { %v1096_v11 = vld [vmem:[#allocation2] sm:$0xff] }
 0x1b4   : >> { %693 = vmatpush.bf16.msra.mxu0 %v1096_v11 }
 0x1b7   : >> { %1081 = vmatmul.msk.bf16.vlgmr.msra.gmra.mxu0 %vm393_vm7, %v1766_v1 }
 0x234   : >> { %v695_v13 = vpop.f32.mrf.mxu0 }
 0x235   : >> { %704 = vst [vmem:[%s703_s16] sm:$0xff] %v695_v13  ;;  %v711_v14 = vmul.f32 %v709_v12, %v695_v13 }
 0x237   : >> { %712 = vadd.xlane.f32.xlu0 %v711_v14 }
 0x23c   : >> { %v697_v15 = vpop.f32.mrf.mxu0 }
 0x2aa   : >> { %v713_v16 = vpop.xlane.xlu0 %712 }
 0x2ab   : >> { %v714_v17 = vrot.slane %v713_v16, 4 }
 0x2ad   : >> { %v715_v18 = vadd.f32 %v714_v17, %v713_v16 }
 0x2af   : >> { %v716_v19 = vrot.slane %v715_v18, 2 }
 0x2b1   : >> { %v717_v20 = vadd.f32 %v716_v19, %v715_v18 }
 0x2b3   : >> { %v718_v21 = vrot.slane %v717_v20, 1 }
 0x2b5   : >> { %v719_v22 = vadd.f32 %v718_v21, %v717_v20 }
 0x2b7   : >> { %1106 = vpush %v719_v22 }
 0x2b8   : > { %1108 = vpush (%p312_p5), %v739_v33 }
 0x2e8   : >> { %s1107_s5 = spop %1106 }
 0x2e9   : >> { %s721_s0 = smul.f32 %s1107_s5, %s707_s3  ;;  %s1905_s4 = spop (%p312_p5), %1108 }
 0x2ea   : > { %314 = sbr.rel (!%p312_p5) target bundleno = 75 (0x4b), region = 145 }
 0x2eb   : >> { %s1896_s6 = sadd.f32 %s1545_s6, %s721_s0  }
 0x2ed   : >> { %s2085_s26 = smov %s1896_s6 }
 0x2ee   : >> { %s2086_s6 = smov %s2085_s26  ;;  %s741_s18 = smul.f32 (%p312_p5), %s1905_s4, %s2085_s26 }
 0x2ef   : > { %s1909_s6 = smov 0.0  }
 0x2f0 LB: >> { %s1085_s8 = sshll.u32 %s1557_s15, 7  ;;  %v755_v1 = vstv %s741_s18  ;;  %p761_p0 = scmp.lt.s32.totalorder %s1557_s15, %s2118_s28  ;;  %s1557_s15 = sphi %s1911_s15, %s747_s15   ;;  %s1553_s6 = sphi %s1909_s6, %s2087_s6  }
 0x2f1   : >> { %s750_s13 = sshra.s32 %s1085_s8, 7  ;;  %s747_s15 = sadd.s32 1, %s1557_s15  }
 0x2f2   : >> { %s1086_s10 = sshll.u32 %s750_s13, 3  ;;  %p744_p1 = scmp.ge.s32.totalorder %s747_s15, 4  }
 0x2f3   : >> { %s753_s16 = scalar_lea.vmem %s1768_s9, %s1086_s10 [#allocation8]  ;;  %s2088_s7 = sld [smem:[#allocation18_spill]] (%p744_p1)  ;;  %v776_v45 = vstv (%p744_p1), %s2085_s26 }
 0x2f4   : >> { %v754_v34 = vld [vmem:[%s753_s16] sm:$0xff]  ;;  %s762_s14 = scalar_select %p761_p0, 1, 0  ;;  %777 = vst [vmem:[%s293_s11] sm:$0x1] (%p744_p1), %v776_v45 }
 0x2f5   : >> { %v756_v35 = vsub.f32 %v754_v34, %v755_v1  ;;  %s2089_s8 = sld [smem:[#allocation17_spill]] (%p744_p1)  ;;  %s785_s13 = sand.u32 (%p744_p1), 1, %s1654_s29  }
 0x2f6   : >> { %s763_s3 = scvt.s32.f32 %s762_s14  ;;  %s2091_s18 = sld [smem:[#allocation28_spill]] (%p744_p1) }
 0x2f7   : >> { %v760_v36 = vmul.f32 %v756_v35, %v709_v12  ;;  %s1946_s24 = scalar_lea.sflag (%p744_p1), [#allocation10], %s785_s13 }
 0x2f9   : >> { %v764_v37 = vmul.f32 %v760_v36, %v760_v36  ;;  %s1091_s16 = sshll.u32 (%p744_p1), %s2088_s7, 1 }
 0x2fb   : >> { %765 = vadd.xlane.f32.xlu0 %v764_v37  ;;  %s1932_s14 = sadd.s32 (%p744_p1), %s2089_s8, %s1091_s16 }
 0x2fc   : > { %s817_s15 = scalar_lea.hbm (%p744_p1), %s2091_s18, %s1932_s14 }
 0x2fd   : > { %s821_s26 = sshll.u32 (%p744_p1), %s817_s15, 4  ;;  %s822_s26 = int_to_ptr.hbm [resolvable:$true] %s821_s26 }
 0x2fe   : > { %s1353_s16 = sshra.s32 (%p744_p1), %s822_s26, 4  ;;  %s1354_s16 = int_to_ptr.hbm [resolvable:$true] %s1353_s16 }
 0x2ff   : > { %s1355_s21 = scalar_lea.hbm (%p744_p1), %s1354_s16, 1 }
 0x300   : > { %p1356_p2 = scmp.ne.s32.totalorder (%p744_p1), %s1354_s16, %s1355_s21 }
 0x302   : > { %p1357_p6 = pnand (%p744_p1), %p1356_p2, %p1681_p11 }
 0x304   : > { %p1358_p7 = pneg (%p744_p1), %p1357_p6 }
 0x36e   : >> { %v766_v38 = vpop.xlane.xlu0 %765 }
 0x36f   : >> { %v767_v39 = vrot.slane %v766_v38, 4 }
 0x371   : >> { %v768_v40 = vadd.f32 %v767_v39, %v766_v38 }
 0x373   : >> { %v769_v41 = vrot.slane %v768_v40, 2 }
 0x375   : >> { %v770_v42 = vadd.f32 %v769_v41, %v768_v40 }
 0x377   : >> { %v771_v43 = vrot.slane %v770_v42, 1 }
 0x379   : >> { %v772_v44 = vadd.f32 %v771_v43, %v770_v42 }
 0x37b   : >> { %1110 = vpush %v772_v44 }
 0x3ac   : >> { %s1111_s5 = spop %1110 }
 0x3ad   : >> { %s774_s0 = smul.f32 %s1111_s5, %s763_s3  ;;  %s819_s3 = sshll.u32 (%p744_p1), %s293_s11, 4  ;;  %s820_s3 = int_to_ptr.vmem [resolvable:$true] %s819_s3 }
 0x3ae   : > { %746 = sbr.rel (!%p744_p1) target bundleno = 752 (0x2f0), region = 156 }
 0x3af   : >> { %s775_s30 = sadd.f32 %s1553_s6, %s774_s0  }
 0x3b0   : > { %s2093_s0 = sld [smem:[#allocation29_spill]] (%p744_p1) }
 0x3b1   : >> { %s2087_s6 = smov %s775_s30  ;;  %v778_v46 = vstv (%p744_p1), %s775_s30 }
 0x3b2   : > { %779 = vst [vmem:[%s299_s17] sm:$0x1] (%p744_p1), %v778_v46  ;;  %s2092_s6 = smov (%p744_p1), %s2091_s18 }
 0x3b3   : > { %s1359_s11 = scalar_lea.hbm %s2092_s6, 4  ;;  %p1360_p8 = scmp.lt.s32.totalorder %s1354_s16, %s2092_s6 }
 0x3b4   : > { %p1361_p4 = scmp.lt.s32.totalorder %s1359_s11, %s1355_s21 }
 0x3b6   : > { %s832_s30 = scalar_lea.hbm %s2093_s0, %s1932_s14  ;;  %p1362_p9 = por %p1361_p4, %p1360_p8 }
 0x3b8   : > { %p1363_p10 = pnand %p1362_p9, %p1358_p7 }
 0x3ba   : > { %1366 = shalt.err (!%p1363_p10)
}
 0x3bb   : > { %1119 = dma.vmem_to_hbm [thread:$0]  (%p1681_p11), %s820_s3, 16, %s822_s26, %s1946_s24  }
 0x3bc   : > { %s1089_s13 = sshll.u32 %s2088_s7, 3  ;;  %s2094_s14 = sshll.u32 %s2089_s8, 2 }
 0x3bd   : > { %s800_s29 = sadd.s32 %s1089_s13, %s2094_s14  ;;  %s804_s5 = sshll.u32 %s1768_s9, 4  ;;  %s805_s5 = int_to_ptr.vmem [resolvable:$true] %s804_s5 }
 0x3be   : > { %s1090_s28 = sshll.u32 %s800_s29, 3  ;;  %s2095_s4 = sld [smem:[#allocation27_spill]] }
 0x3bf   : > { %s1968_s18 = sshll.u32 %s299_s17, 4  ;;  %s1971_s6 = sshll.u32 %s832_s30, 4  ;;  %s835_s18 = int_to_ptr.vmem [resolvable:$true] %s1968_s18  ;;  %s837_s6 = int_to_ptr.hbm [resolvable:$true] %s1971_s6 }
 0x3c0   : > { %s781_s7 = scalar_lea.sflag [#allocation5], %s1753_s1 }
 0x3c4   : > { %s802_s11 = scalar_lea.hbm %s2095_s4, %s1090_s28  ;;  %s1387_s13 = scalar_lea.hbm %s2095_s4, 128 }
 0x3c5   : > { %s806_s15 = sshll.u32 %s802_s11, 4  ;;  %s807_s15 = int_to_ptr.hbm [resolvable:$true] %s806_s15 }
 0x3c6   : > { %s1381_s8 = sshra.s32 %s807_s15, 4  ;;  %s1382_s8 = int_to_ptr.hbm [resolvable:$true] %s1381_s8 }
 0x3c7   : > { %s1383_s3 = scalar_lea.hbm %s1382_s8, 32  ;;  %p1388_p0 = scmp.lt.s32.totalorder %s1382_s8, %s2095_s4 }
 0x3c8   : > { %p1384_p12 = scmp.ne.s32.totalorder %s1382_s8, %s1383_s3  ;;  %p1389_p1 = scmp.lt.s32.totalorder %s1387_s13, %s1383_s3 }
 0x3ca   : > { %p1385_p3 = pnand %p1384_p12, %p1681_p11  ;;  %p1390_p2 = por %p1389_p1, %p1388_p0 }
 0x3cc   : > { %p1386_p5 = pneg %p1385_p3 }
 0x3ce   : > { %p1391_p6 = pnand %p1390_p2, %p1386_p5 }
 0x3d0   : > { %1394 = shalt.err (!%p1391_p6)
}
 0x3d1   : > { %1118 = dma.vmem_to_hbm [thread:$0]  (%p1681_p11), %s805_s5, 512, %s807_s15, %s781_s7  }
 0x3d2   : > { %s1409_s1 = sshra.s32 %s837_s6, 4  ;;  %s1415_s21 = scalar_lea.hbm %s2093_s0, 4  ;;  %s1410_s1 = int_to_ptr.hbm [resolvable:$true] %s1409_s1 }
 0x3d3   : > { %s1411_s30 = scalar_lea.hbm %s1410_s1, 1  ;;  %p1416_p9 = scmp.lt.s32.totalorder %s1410_s1, %s2093_s0 }
 0x3d4   : > { %p1412_p7 = scmp.ne.s32.totalorder %s1410_s1, %s1411_s30  ;;  %p1417_p10 = scmp.lt.s32.totalorder %s1415_s21, %s1411_s30 }
 0x3d6   : > { %p1413_p8 = pnand %p1412_p7, %p1681_p11  ;;  %p1418_p12 = por %p1417_p10, %p1416_p9 }
 0x3d8   : > { %p1414_p4 = pneg %p1413_p8 }
 0x3da   : > { %p1419_p3 = pnand %p1418_p12, %p1414_p4 }
 0x3dc   : > { %1422 = shalt.err (!%p1419_p3)
}
 0x3dd   : > { %1120 = dma.vmem_to_hbm [thread:$0]  (%p1681_p11), %s835_s18, 16, %s837_s6, %s1946_s24  }
 0x3de PF: > { %s2096_s5 = sld [smem:[#allocation20_spill]] }
 0x3df   : > { %s2097_s15 = sld [smem:[#allocation16_spill]] }
 0x3e4   : > { %p1145_p5 = scmp.ge.s32.totalorder %s2096_s5, 2 }
 0x3e5   : > { %s848_s8 = sand.u32 1, %s2097_s15  }
 0x3e6   : > { %p1133_p0 = pnand %p1145_p5, %p1686_p13  ;;  %s849_s3 = scalar_lea.sflag [#allocation5], %s848_s8 }
 0x3e8   : > { %p1134_p1 = pneg %p1133_p0 }
 0x3ea   : > { %1492 = dma.done.wait (%p1134_p1), %s849_s3, 512  }
 0x3eb   : > { %1494 = vsyncadd (%p1134_p1), %s849_s3, 4294966784  ;;  %s2099_s9 = sadd.s32 4294967294, %s2096_s5  }
 0x3ec   : > { %s858_s26 = sand.u32 1, %s2099_s9  }
 0x3ed   : > { %s859_s10 = scalar_lea.sflag [#allocation10], %s858_s26 }
 0x3ee   : > { %1496 = dma.done.wait (%p1134_p1), %s859_s10, 32  }
 0x3ef   : > { %1498 = vsyncadd (%p1134_p1), %s859_s10, 4294967264  ;;  %s26_s28 = sadd.s32 1, %s2096_s5   ;;  %s2100_s24 = sld [smem:[#allocation19_spill]] }
 0x3f0   : > { %p23_p11 = scmp.ge.s32.totalorder %s26_s28, 6   ;;  %s2101_s6 = sld [smem:[#allocation23_spill]] }
 0x3f1   : > { %s2102_s18 = smov %s1505_s19  ;;  %s2103_s19 = smov %s1509_s20 }
 0x3f2   : > { %s2104_s20 = smov %s1731_s25  ;;  %s2105_s21 = smov %s1517_s22 }
 0x3f3   : > { %s2106_s22 = smov %s1521_s23  ;;  %s2107_s23 = smov %s1734_s2 }
 0x3f4   : > { %s2108_s25 = smov %s1537_s27  ;;  %s2109_s26 = smov %s2112_s12 }
 0x3f5   :  { %25 = sbr.rel (!%p23_p11) target bundleno = 19 (0x13), region = 167 }
 0x3f6   : > { %s2110_s27 = smov %s2101_s6 }
 0x3fa   :  { %873 = vsyncpa [#allocation4], 1 }
 0x3fb   :  { %875 = vsyncpa [#allocation4 + $0x1], 1 }
 0x3fc   :  { %876 = vsyncpa [#allocation7], 1 }
 0x3fd   :  { %877 = vsyncpa [#allocation5], 1 }
 0x3fe   :  { %879 = vsyncpa [#allocation5 + $0x1], 1 }
 0x3ff   :  { %880 = vsyncpa [#allocation10], 1 }
 0x400   :  { %882 = vsyncpa [#allocation10 + $0x1], 1 }

</bundles_post_ra>
